<compile_context>
chip_gen: v7x
topology: tpu7x:2x2x1
jax: 0.10.0
libtpu: 0.0.40
codegen_flags: <defaults>
</compile_context>

<pallas_src>
import functools

import jax
import jax.numpy as jnp
from jax.experimental import pallas as pl
from jax.experimental.pallas import tpu as pltpu


def _swish(x):
    return x * jax.nn.sigmoid(x)


def _round_up(v, m):
    return ((v + m - 1) // m) * m


# ---------------------------------------------------------------------------
# Fused MBConv kernel.  One grid step processes NB images folded onto lanes.
#   x:     (Cin,  NB*HW)   channels on sublanes, (image, pixel) on lanes
#   wmask: (k*k, Cexp, NB*HW)  depthwise weights with BN1 scale AND the SAME
#                              zero-padding validity mask folded in
#   p:     (R, 128)        packed slab of all small parameters (see wrapper)
#   o:     (Cout, NB*HW)
# ---------------------------------------------------------------------------
def mbconv_kernel(x_ref, wm_ref, p_ref, o_ref, *,
                  k, H, W, nb, cin, cexp, csq, cout,
                  c_wexp, c_wproj, c_wsr, c_wse, c_bsr,
                  c_b0, c_b1, c_bse, c_b2, add_skip):
    HW = H * W
    L = nb * HW
    pad = (k - 1) // 2

    x = x_ref[...]                                          # (Cin, L)
    p = p_ref[...]                                          # (R, 128)

    # static slices into the packed parameter slab (pure vreg ops)
    wexp = p[:cexp, c_wexp:c_wexp + cin]                    # (Cexp, Cin)
    wproj = p[:cout, c_wproj:c_wproj + cexp]                # (Cout, Cexp)
    wsr = p[:cexp, c_wsr:c_wsr + csq]                       # (Cexp, Csq)
    wse = p[:cexp, c_wse:c_wse + csq]                       # (Cexp, Csq)
    bsr = p[0:1, c_bsr:c_bsr + csq]                         # (1, Csq)
    b0 = p[:cexp, c_b0:c_b0 + 1]                            # (Cexp, 1)
    b1 = p[:cexp, c_b1:c_b1 + 1]                            # (Cexp, 1)
    bse = p[:cexp, c_bse:c_bse + 1]                         # (Cexp, 1)
    b2 = p[:cout, c_b2:c_b2 + 1]                            # (Cout, 1)

    # ---- expand 1x1 conv (BN0 scale folded) + bias + swish ----
    # MXU: M=Cexp, K=Cin, N=NB*HW (lane-dense result layout).
    y1 = _swish(jnp.dot(wexp, x, preferred_element_type=jnp.float32) + b0)

    # ---- depthwise kxk conv, stride 1, SAME: lane roll * pre-masked weight ----
    acc = jnp.zeros_like(y1)
    for dy in range(k):                                     # static taps
        for dx in range(k):
            t = dy * k + dx
            off = (dy - pad) * W + (dx - pad)
            shifted = pltpu.roll(y1, shift=(-off) % L, axis=1) if off else y1
            acc = acc + shifted * wm_ref[t]                 # mask folded in
    y2 = _swish(acc + b1)                                   # (Cexp, L)

    # ---- squeeze-excite, per image segment (tiny GEMVs on VPU/XLU) ----
    inv_hw = 1.0 / HW
    segs = []
    for n in range(nb):                                     # static, nb small
        seg = y2[:, n * HW:(n + 1) * HW]                    # (Cexp, HW)
        pooled = jnp.sum(seg, axis=1, keepdims=True) * inv_hw        # (Cexp,1)
        s = _swish(jnp.sum(wsr * pooled, axis=0, keepdims=True) + bsr)  # (1,Csq)
        gate = jax.nn.sigmoid(
            jnp.sum(wse * s, axis=1, keepdims=True) + bse)            # (Cexp,1)
        segs.append(seg * gate)
    y3 = segs[0] if nb == 1 else jnp.concatenate(segs, axis=1)        # (Cexp,L)

    # ---- project 1x1 conv (BN2 scale folded) + bias (+ identity skip) ----
    out = jnp.dot(wproj, y3, preferred_element_type=jnp.float32) + b2
    if add_skip:
        out = out + x
    o_ref[...] = out


# ---------------------------------------------------------------------------
# One-time parameter preparation + jitted forward factory (eval-mode BN).
# num_steps: grid steps over batch groups.  1 = whole batch in one step (best
# on v5e/v6e, single TC).  Use 2 on v7x so both TensorCores get work.
# ---------------------------------------------------------------------------
def make_mbconv_forward(params, *, batch, height, width, kernel_size=3,
                        stride=1, eps=1e-3, id_skip=True, num_steps=1):
    # TODO(synk): stride > 1 / even-kernel TF-SAME depthwise, expand_ratio==1
    # (no expand stage), the no-SE variant and training-time drop_connect are
    # not implemented; the tested block uses stride 1, odd kernel, SE, eval.
    assert stride == 1 and kernel_size % 2 == 1
    assert batch % num_steps == 0

    N, H, W, k = batch, height, width, kernel_size
    HW = H * W
    NB = N // num_steps          # images folded onto lanes per grid step
    L = NB * HW
    pad = (k - 1) // 2

    Cin, Cexp = params["w_expand"].shape
    Cout = params["w_project"].shape[1]
    Csq = params["w_se_reduce"].shape[1]
    add_skip = id_skip and stride == 1 and (Cin == Cout)

    def fold(bn):
        scale = bn["gamma"] / jnp.sqrt(bn["var"] + eps)
        return scale, bn["beta"] - bn["mean"] * scale

    s0, b0 = fold(params["bn0"])
    s1, b1 = fold(params["bn1"])
    s2, b2 = fold(params["bn2"])

    # Fold BN scales into conv weights; (C_out_stage, C_in_stage) layout keeps
    # activations channels-on-sublanes / (image,pixel)-on-lanes.
    wexp = (params["w_expand"] * s0[None, :]).T.astype(jnp.float32)    # (Cexp,Cin)
    wproj = (params["w_project"] * s2[None, :]).T.astype(jnp.float32)  # (Cout,Cexp)
    wdw = (params["w_dw"].reshape(k * k, Cexp).T
           * s1[:, None]).astype(jnp.float32)                          # (Cexp,k*k)

    # Pre-masked depthwise weight planes: SAME zero padding folded into the
    # weights, per-image validity so rolls never leak across image boundaries.
    hw = jnp.arange(HW)
    hh, ww = hw // W, hw % W
    planes = []
    for dy in range(k):
        for dx in range(k):
            sh, sw = hh + dy - pad, ww + dx - pad
            valid = ((sh >= 0) & (sh < H) & (sw >= 0) & (sw < W))
            planes.append(jnp.tile(valid.astype(jnp.float32), NB))     # (L,)
    mask = jnp.stack(planes)                                           # (k*k, L)
    wmask = wdw.T[:, :, None] * mask[:, None, :]                       # (k*k,Cexp,L)

    # Pack every small parameter into ONE lane-dense (R, 128) slab -> 1 DMA.
    R = _round_up(max(Cexp, Cout, 8), 8)
    c = 0
    c_wexp = c; c += Cin
    c_wproj = c; c += Cexp
    c_wsr = c; c += Csq
    c_wse = c; c += Csq
    c_bsr = c; c += Csq
    c_b0 = c; c += 1
    c_b1 = c; c += 1
    c_bse = c; c += 1
    c_b2 = c; c += 1
    Lp = _round_up(c, 128)
    pslab = jnp.zeros((R, Lp), jnp.float32)
    pslab = pslab.at[:Cexp, c_wexp:c_wexp + Cin].set(wexp)
    pslab = pslab.at[:Cout, c_wproj:c_wproj + Cexp].set(wproj)
    pslab = pslab.at[:Cexp, c_wsr:c_wsr + Csq].set(
        params["w_se_reduce"].astype(jnp.float32))
    pslab = pslab.at[:Cexp, c_wse:c_wse + Csq].set(
        params["w_se_expand"].T.astype(jnp.float32))
    pslab = pslab.at[0:1, c_bsr:c_bsr + Csq].set(
        params["b_se_reduce"].astype(jnp.float32))
    pslab = pslab.at[:Cexp, c_b0:c_b0 + 1].set(b0[:, None].astype(jnp.float32))
    pslab = pslab.at[:Cexp, c_b1:c_b1 + 1].set(b1[:, None].astype(jnp.float32))
    pslab = pslab.at[:Cexp, c_bse:c_bse + 1].set(
        params["b_se_expand"].T.astype(jnp.float32))
    pslab = pslab.at[:Cout, c_b2:c_b2 + 1].set(b2[:, None].astype(jnp.float32))

    kern = functools.partial(
        mbconv_kernel, k=k, H=H, W=W, nb=NB, cin=Cin, cexp=Cexp, csq=Csq,
        cout=Cout, c_wexp=c_wexp, c_wproj=c_wproj, c_wsr=c_wsr, c_wse=c_wse,
        c_bsr=c_bsr, c_b0=c_b0, c_b1=c_b1, c_bse=c_bse, c_b2=c_b2,
        add_skip=add_skip)

    pcall = pl.pallas_call(
        kern,
        out_shape=jax.ShapeDtypeStruct((Cout, N * HW), jnp.float32),
        grid=(num_steps,),
        in_specs=[
            pl.BlockSpec((Cin, L), lambda g: (0, g)),
            pl.BlockSpec((k * k, Cexp, L), lambda g: (0, 0, 0)),   # constant
            pl.BlockSpec((R, Lp), lambda g: (0, 0)),               # constant
        ],
        out_specs=pl.BlockSpec((Cout, L), lambda g: (0, g)),
        compiler_params=pltpu.CompilerParams(
            dimension_semantics=("parallel",)),
    )

    def forward(x_nchw):
        # NCHW -> (Cin, N*HW) with batch folded onto the lane axis.
        xf = x_nchw.astype(jnp.float32).reshape(N, Cin, HW)
        x2 = xf.transpose(1, 0, 2).reshape(Cin, N * HW)
        out = pcall(x2, wmask, pslab)
        return out.reshape(Cout, N, HW).transpose(1, 0, 2).reshape(N, Cout, H, W)

    return jax.jit(forward)


# ---------------------------------------------------------------------------
# Pure-JAX reference (same math, NCHW) for verification.
# ---------------------------------------------------------------------------
def reference_forward(x, params, *, kernel_size=3, eps=1e-3, id_skip=True):
    def bn(y, pp):
        sc = pp["gamma"] / jnp.sqrt(pp["var"] + eps)
        bi = pp["beta"] - pp["mean"] * sc
        return y * sc[None, :, None, None] + bi[None, :, None, None]

    def swish(v):
        return v * jax.nn.sigmoid(v)

    N, Cin, H, W = x.shape
    y = jnp.einsum("nchw,co->nohw", x, params["w_expand"])
    y = swish(bn(y, params["bn0"]))
    p = (kernel_size - 1) // 2
    yp = jnp.pad(y, ((0, 0), (0, 0), (p, p), (p, p)))
    acc = jnp.zeros_like(y)
    for dy in range(kernel_size):
        for dx in range(kernel_size):
            acc = acc + yp[:, :, dy:dy + H, dx:dx + W] * \
                params["w_dw"][dy, dx][None, :, None, None]
    y = swish(bn(acc, params["bn1"]))
    pooled = jnp.mean(y, axis=(2, 3))
    s = swish(pooled @ params["w_se_reduce"] + params["b_se_reduce"][0])
    s = s @ params["w_se_expand"] + params["b_se_expand"][0]
    y = y * jax.nn.sigmoid(s)[:, :, None, None]
    y = bn(jnp.einsum("nchw,co->nohw", y, params["w_project"]), params["bn2"])
    Cout = y.shape[1]
    if id_skip and Cin == Cout:
        y = y + x
    return y


def make_params(key, Cin, Cexp, Csq, Cout, k):
    ks = jax.random.split(key, 16)

    def bn_params(k0, C):
        k1, k2, k3, k4 = jax.random.split(k0, 4)
        return {
            "gamma": 1.0 + 0.1 * jax.random.normal(k1, (C,), jnp.float32),
            "beta": 0.1 * jax.random.normal(k2, (C,), jnp.float32),
            "mean": 0.1 * jax.random.normal(k3, (C,), jnp.float32),
            "var": jax.random.uniform(k4, (C,), jnp.float32, 0.5, 1.5),
        }

    return {
        "w_expand": 0.2 * jax.random.normal(ks[0], (Cin, Cexp), jnp.float32),
        "bn0": bn_params(ks[1], Cexp),
        "w_dw": 0.2 * jax.random.normal(ks[2], (k, k, Cexp), jnp.float32),
        "bn1": bn_params(ks[3], Cexp),
        "w_se_reduce": 0.2 * jax.random.normal(ks[4], (Cexp, Csq), jnp.float32),
        "b_se_reduce": 0.1 * jax.random.normal(ks[5], (1, Csq), jnp.float32),
        "w_se_expand": 0.2 * jax.random.normal(ks[6], (Csq, Cexp), jnp.float32),
        "b_se_expand": 0.1 * jax.random.normal(ks[7], (1, Cexp), jnp.float32),
        "w_project": 0.2 * jax.random.normal(ks[8], (Cexp, Cout), jnp.float32),
        "bn2": bn_params(ks[9], Cout),
    }


if __name__ == "__main__":
    # Block config: input_filters=8, expand_ratio=4 -> Cexp=32, kernel=3,
    # stride=1, se_ratio=0.25 -> Csq=max(1, int(8*0.25))=2, output_filters=8,
    # id_skip=True, drop_connect_rate=None (eval mode).
    N, Cin, H, W = 2, 8, 16, 16
    expand_ratio, k, Cout = 4, 3, 8
    Cexp = Cin * expand_ratio
    Csq = max(1, int(Cin * 0.25))

    key = jax.random.PRNGKey(0)
    kx, kp = jax.random.split(key)
    x = jax.random.normal(kx, (N, Cin, H, W), jnp.float32)
    params = make_params(kp, Cin, Cexp, Csq, Cout, k)

    # One-time prep (BN folding, packing, masks) hoisted out of the call path.
    # num_steps=1 folds the whole batch into one grid step (v5e/v6e optimum);
    # on v7x use num_steps=2 to keep both TensorCores busy.
    fwd = make_mbconv_forward(params, batch=N, height=H, width=W,
                              kernel_size=k, stride=1, eps=1e-3,
                              id_skip=True, num_steps=1)

    out = jax.block_until_ready(fwd(x))
    ref = jax.block_until_ready(
        reference_forward(x, params, kernel_size=k, eps=1e-3, id_skip=True))

    assert out.shape == (N, Cout, H, W)
    assert jnp.allclose(out, ref, atol=1e-3, rtol=1e-3)
    print("KERNEL_OK")
</pallas_src>

<mosaic_0001>
module attributes {stable_mosaic.version = 11 : i64} {
  func.func @mbconv_kernel(%arg0: i32, %arg1: memref<8x512xf32, #tpu.memory_space<vmem>>, %arg2: memref<9x32x512xf32, #tpu.memory_space<vmem>>, %arg3: memref<32x128xf32, #tpu.memory_space<vmem>>, %arg4: memref<8x512xf32, #tpu.memory_space<vmem>>) attributes {dimension_semantics = [#tpu.dimension_semantics<parallel>], iteration_bounds = array<i64: 1>, scalar_prefetch = 0 : i64, scratch_operands = 0 : i64, tpu.core_type = #tpu.core_type<tc>, window_params = [{transform_indices = @transform_0, window_bounds = array<i64: 8, 512>}, {pipeline_mode = #tpu.pipeline_mode<synchronous>, transform_indices = @transform_1, window_bounds = array<i64: 9, 32, 512>}, {pipeline_mode = #tpu.pipeline_mode<synchronous>, transform_indices = @transform_2, window_bounds = array<i64: 32, 128>}, {transform_indices = @transform_3, window_bounds = array<i64: 8, 512>}]} {
    %c0 = arith.constant 0 : index
    %c0_0 = arith.constant 0 : index
    %0 = vector.load %arg1[%c0, %c0_0] : memref<8x512xf32, #tpu.memory_space<vmem>>, vector<8x512xf32>
    %c0_1 = arith.constant 0 : index
    %c0_2 = arith.constant 0 : index
    %1 = vector.load %arg3[%c0_1, %c0_2] : memref<32x128xf32, #tpu.memory_space<vmem>>, vector<32x128xf32>
    %2 = vector.extract_strided_slice %1 {offsets = [0, 0], sizes = [32, 8], strides = [1, 1]} : vector<32x128xf32> to vector<32x8xf32>
    %3 = vector.extract_strided_slice %1 {offsets = [0, 8], sizes = [8, 32], strides = [1, 1]} : vector<32x128xf32> to vector<8x32xf32>
    %4 = vector.extract_strided_slice %1 {offsets = [0, 40], sizes = [32, 2], strides = [1, 1]} : vector<32x128xf32> to vector<32x2xf32>
    %5 = vector.extract_strided_slice %1 {offsets = [0, 42], sizes = [32, 2], strides = [1, 1]} : vector<32x128xf32> to vector<32x2xf32>
    %6 = vector.extract_strided_slice %1 {offsets = [0, 44], sizes = [1, 2], strides = [1, 1]} : vector<32x128xf32> to vector<1x2xf32>
    %7 = vector.extract_strided_slice %1 {offsets = [0, 46], sizes = [32, 1], strides = [1, 1]} : vector<32x128xf32> to vector<32x1xf32>
    %8 = vector.extract_strided_slice %1 {offsets = [0, 47], sizes = [32, 1], strides = [1, 1]} : vector<32x128xf32> to vector<32x1xf32>
    %9 = vector.extract_strided_slice %1 {offsets = [0, 48], sizes = [32, 1], strides = [1, 1]} : vector<32x128xf32> to vector<32x1xf32>
    %10 = vector.extract_strided_slice %1 {offsets = [0, 49], sizes = [8, 1], strides = [1, 1]} : vector<32x128xf32> to vector<8x1xf32>
    %cst = arith.constant dense<0.000000e+00> : vector<32x512xf32>
    %11 = tpu.matmul %2, %0, %cst {dimension_numbers = #tpu.dot_dimension_numbers<[1], [0], [0], [1], [0, 0, 1, 1], [], []>} : vector<32x8xf32>, vector<8x512xf32>, vector<32x512xf32> -> vector<32x512xf32>
    %12 = vector.broadcast %7 : vector<32x1xf32> to vector<32x512xf32>
    %13 = arith.addf %11, %12 : vector<32x512xf32>
    %14 = arith.negf %13 : vector<32x512xf32>
    %15 = math.exp %14 : vector<32x512xf32>
    %cst_3 = arith.constant 1.000000e+00 : f32
    %16 = vector.broadcast %cst_3 : f32 to vector<32x512xf32>
    %17 = arith.addf %16, %15 : vector<32x512xf32>
    %18 = arith.divf %16, %17 : vector<32x512xf32>
    %19 = arith.mulf %13, %18 : vector<32x512xf32>
    %cst_4 = arith.constant 0.000000e+00 : f32
    %20 = vector.broadcast %cst_4 : f32 to vector<32x512xf32>
    %c17_i32 = arith.constant 17 : i32
    %21 = tpu.dynamic_rotate %19 by %c17_i32 dim 1 : vector<32x512xf32>, i32 -> vector<32x512xf32>
    %c0_5 = arith.constant 0 : index
    %c0_6 = arith.constant 0 : index
    %c0_7 = arith.constant 0 : index
    %22 = vector.load %arg2[%c0_5, %c0_6, %c0_7] : memref<9x32x512xf32, #tpu.memory_space<vmem>>, vector<1x32x512xf32>
    %23 = vector.shape_cast %22 : vector<1x32x512xf32> to vector<32x512xf32>
    %24 = arith.mulf %21, %23 : vector<32x512xf32>
    %25 = arith.addf %20, %24 : vector<32x512xf32>
    %c16_i32 = arith.constant 16 : i32
    %26 = tpu.dynamic_rotate %19 by %c16_i32 dim 1 : vector<32x512xf32>, i32 -> vector<32x512xf32>
    %c1 = arith.constant 1 : index
    %c0_8 = arith.constant 0 : index
    %c0_9 = arith.constant 0 : index
    %27 = vector.load %arg2[%c1, %c0_8, %c0_9] : memref<9x32x512xf32, #tpu.memory_space<vmem>>, vector<1x32x512xf32>
    %28 = vector.shape_cast %27 : vector<1x32x512xf32> to vector<32x512xf32>
    %29 = arith.mulf %26, %28 : vector<32x512xf32>
    %30 = arith.addf %25, %29 : vector<32x512xf32>
    %c15_i32 = arith.constant 15 : i32
    %31 = tpu.dynamic_rotate %19 by %c15_i32 dim 1 : vector<32x512xf32>, i32 -> vector<32x512xf32>
    %c2 = arith.constant 2 : index
    %c0_10 = arith.constant 0 : index
    %c0_11 = arith.constant 0 : index
    %32 = vector.load %arg2[%c2, %c0_10, %c0_11] : memref<9x32x512xf32, #tpu.memory_space<vmem>>, vector<1x32x512xf32>
    %33 = vector.shape_cast %32 : vector<1x32x512xf32> to vector<32x512xf32>
    %34 = arith.mulf %31, %33 : vector<32x512xf32>
    %35 = arith.addf %30, %34 : vector<32x512xf32>
    %c1_i32 = arith.constant 1 : i32
    %36 = tpu.dynamic_rotate %19 by %c1_i32 dim 1 : vector<32x512xf32>, i32 -> vector<32x512xf32>
    %c3 = arith.constant 3 : index
    %c0_12 = arith.constant 0 : index
    %c0_13 = arith.constant 0 : index
    %37 = vector.load %arg2[%c3, %c0_12, %c0_13] : memref<9x32x512xf32, #tpu.memory_space<vmem>>, vector<1x32x512xf32>
    %38 = vector.shape_cast %37 : vector<1x32x512xf32> to vector<32x512xf32>
    %39 = arith.mulf %36, %38 : vector<32x512xf32>
    %40 = arith.addf %35, %39 : vector<32x512xf32>
    %c4 = arith.constant 4 : index
    %c0_14 = arith.constant 0 : index
    %c0_15 = arith.constant 0 : index
    %41 = vector.load %arg2[%c4, %c0_14, %c0_15] : memref<9x32x512xf32, #tpu.memory_space<vmem>>, vector<1x32x512xf32>
    %42 = vector.shape_cast %41 : vector<1x32x512xf32> to vector<32x512xf32>
    %43 = arith.mulf %19, %42 : vector<32x512xf32>
    %44 = arith.addf %40, %43 : vector<32x512xf32>
    %c511_i32 = arith.constant 511 : i32
    %45 = tpu.dynamic_rotate %19 by %c511_i32 dim 1 : vector<32x512xf32>, i32 -> vector<32x512xf32>
    %c5 = arith.constant 5 : index
    %c0_16 = arith.constant 0 : index
    %c0_17 = arith.constant 0 : index
    %46 = vector.load %arg2[%c5, %c0_16, %c0_17] : memref<9x32x512xf32, #tpu.memory_space<vmem>>, vector<1x32x512xf32>
    %47 = vector.shape_cast %46 : vector<1x32x512xf32> to vector<32x512xf32>
    %48 = arith.mulf %45, %47 : vector<32x512xf32>
    %49 = arith.addf %44, %48 : vector<32x512xf32>
    %c497_i32 = arith.constant 497 : i32
    %50 = tpu.dynamic_rotate %19 by %c497_i32 dim 1 : vector<32x512xf32>, i32 -> vector<32x512xf32>
    %c6 = arith.constant 6 : index
    %c0_18 = arith.constant 0 : index
    %c0_19 = arith.constant 0 : index
    %51 = vector.load %arg2[%c6, %c0_18, %c0_19] : memref<9x32x512xf32, #tpu.memory_space<vmem>>, vector<1x32x512xf32>
    %52 = vector.shape_cast %51 : vector<1x32x512xf32> to vector<32x512xf32>
    %53 = arith.mulf %50, %52 : vector<32x512xf32>
    %54 = arith.addf %49, %53 : vector<32x512xf32>
    %c496_i32 = arith.constant 496 : i32
    %55 = tpu.dynamic_rotate %19 by %c496_i32 dim 1 : vector<32x512xf32>, i32 -> vector<32x512xf32>
    %c7 = arith.constant 7 : index
    %c0_20 = arith.constant 0 : index
    %c0_21 = arith.constant 0 : index
    %56 = vector.load %arg2[%c7, %c0_20, %c0_21] : memref<9x32x512xf32, #tpu.memory_space<vmem>>, vector<1x32x512xf32>
    %57 = vector.shape_cast %56 : vector<1x32x512xf32> to vector<32x512xf32>
    %58 = arith.mulf %55, %57 : vector<32x512xf32>
    %59 = arith.addf %54, %58 : vector<32x512xf32>
    %c495_i32 = arith.constant 495 : i32
    %60 = tpu.dynamic_rotate %19 by %c495_i32 dim 1 : vector<32x512xf32>, i32 -> vector<32x512xf32>
    %c8 = arith.constant 8 : index
    %c0_22 = arith.constant 0 : index
    %c0_23 = arith.constant 0 : index
    %61 = vector.load %arg2[%c8, %c0_22, %c0_23] : memref<9x32x512xf32, #tpu.memory_space<vmem>>, vector<1x32x512xf32>
    %62 = vector.shape_cast %61 : vector<1x32x512xf32> to vector<32x512xf32>
    %63 = arith.mulf %60, %62 : vector<32x512xf32>
    %64 = arith.addf %59, %63 : vector<32x512xf32>
    %65 = vector.broadcast %8 : vector<32x1xf32> to vector<32x512xf32>
    %66 = arith.addf %64, %65 : vector<32x512xf32>
    %67 = arith.negf %66 : vector<32x512xf32>
    %68 = math.exp %67 : vector<32x512xf32>
    %cst_24 = arith.constant 1.000000e+00 : f32
    %69 = vector.broadcast %cst_24 : f32 to vector<32x512xf32>
    %70 = arith.addf %69, %68 : vector<32x512xf32>
    %71 = arith.divf %69, %70 : vector<32x512xf32>
    %72 = arith.mulf %66, %71 : vector<32x512xf32>
    %73 = vector.extract_strided_slice %72 {offsets = [0, 0], sizes = [32, 256], strides = [1, 1]} : vector<32x512xf32> to vector<32x256xf32>
    %cst_25 = arith.constant dense<0.000000e+00> : vector<32xf32>
    %74 = vector.multi_reduction <add>, %73, %cst_25 [1] : vector<32x256xf32> to vector<32xf32>
    %75 = vector.shape_cast %74 : vector<32xf32> to vector<32x1xf32>
    %cst_26 = arith.constant 3.906250e-03 : f32
    %76 = vector.broadcast %cst_26 : f32 to vector<32x1xf32>
    %77 = arith.mulf %75, %76 : vector<32x1xf32>
    %78 = vector.broadcast %77 : vector<32x1xf32> to vector<32x2xf32>
    %79 = arith.mulf %4, %78 : vector<32x2xf32>
    %cst_27 = arith.constant dense<0.000000e+00> : vector<2xf32>
    %80 = vector.multi_reduction <add>, %79, %cst_27 [0] : vector<32x2xf32> to vector<2xf32>
    %81 = vector.shape_cast %80 : vector<2xf32> to vector<1x2xf32>
    %82 = arith.addf %81, %6 : vector<1x2xf32>
    %83 = arith.negf %82 : vector<1x2xf32>
    %84 = math.exp %83 : vector<1x2xf32>
    %cst_28 = arith.constant 1.000000e+00 : f32
    %85 = vector.broadcast %cst_28 : f32 to vector<1x2xf32>
    %86 = arith.addf %85, %84 : vector<1x2xf32>
    %87 = arith.divf %85, %86 : vector<1x2xf32>
    %88 = arith.mulf %82, %87 : vector<1x2xf32>
    %89 = vector.broadcast %88 : vector<1x2xf32> to vector<32x2xf32>
    %90 = arith.mulf %5, %89 : vector<32x2xf32>
    %cst_29 = arith.constant dense<0.000000e+00> : vector<32xf32>
    %91 = vector.multi_reduction <add>, %90, %cst_29 [1] : vector<32x2xf32> to vector<32xf32>
    %92 = vector.shape_cast %91 : vector<32xf32> to vector<32x1xf32>
    %93 = arith.addf %92, %9 : vector<32x1xf32>
    %94 = arith.negf %93 : vector<32x1xf32>
    %95 = math.exp %94 : vector<32x1xf32>
    %cst_30 = arith.constant 1.000000e+00 : f32
    %96 = vector.broadcast %cst_30 : f32 to vector<32x1xf32>
    %97 = arith.addf %96, %95 : vector<32x1xf32>
    %98 = arith.divf %96, %97 : vector<32x1xf32>
    %99 = vector.broadcast %98 : vector<32x1xf32> to vector<32x256xf32>
    %100 = arith.mulf %73, %99 : vector<32x256xf32>
    %101 = vector.extract_strided_slice %72 {offsets = [0, 256], sizes = [32, 256], strides = [1, 1]} : vector<32x512xf32> to vector<32x256xf32>
    %cst_31 = arith.constant dense<0.000000e+00> : vector<32xf32>
    %102 = vector.multi_reduction <add>, %101, %cst_31 [1] : vector<32x256xf32> to vector<32xf32>
    %103 = vector.shape_cast %102 : vector<32xf32> to vector<32x1xf32>
    %cst_32 = arith.constant 3.906250e-03 : f32
    %104 = vector.broadcast %cst_32 : f32 to vector<32x1xf32>
    %105 = arith.mulf %103, %104 : vector<32x1xf32>
    %106 = vector.broadcast %105 : vector<32x1xf32> to vector<32x2xf32>
    %107 = arith.mulf %4, %106 : vector<32x2xf32>
    %cst_33 = arith.constant dense<0.000000e+00> : vector<2xf32>
    %108 = vector.multi_reduction <add>, %107, %cst_33 [0] : vector<32x2xf32> to vector<2xf32>
    %109 = vector.shape_cast %108 : vector<2xf32> to vector<1x2xf32>
    %110 = arith.addf %109, %6 : vector<1x2xf32>
    %111 = arith.negf %110 : vector<1x2xf32>
    %112 = math.exp %111 : vector<1x2xf32>
    %cst_34 = arith.constant 1.000000e+00 : f32
    %113 = vector.broadcast %cst_34 : f32 to vector<1x2xf32>
    %114 = arith.addf %113, %112 : vector<1x2xf32>
    %115 = arith.divf %113, %114 : vector<1x2xf32>
    %116 = arith.mulf %110, %115 : vector<1x2xf32>
    %117 = vector.broadcast %116 : vector<1x2xf32> to vector<32x2xf32>
    %118 = arith.mulf %5, %117 : vector<32x2xf32>
    %cst_35 = arith.constant dense<0.000000e+00> : vector<32xf32>
    %119 = vector.multi_reduction <add>, %118, %cst_35 [1] : vector<32x2xf32> to vector<32xf32>
    %120 = vector.shape_cast %119 : vector<32xf32> to vector<32x1xf32>
    %121 = arith.addf %120, %9 : vector<32x1xf32>
    %122 = arith.negf %121 : vector<32x1xf32>
    %123 = math.exp %122 : vector<32x1xf32>
    %cst_36 = arith.constant 1.000000e+00 : f32
    %124 = vector.broadcast %cst_36 : f32 to vector<32x1xf32>
    %125 = arith.addf %124, %123 : vector<32x1xf32>
    %126 = arith.divf %124, %125 : vector<32x1xf32>
    %127 = vector.broadcast %126 : vector<32x1xf32> to vector<32x256xf32>
    %128 = arith.mulf %101, %127 : vector<32x256xf32>
    %129 = tpu.concatenate %100, %128 in 1 : vector<32x256xf32>, vector<32x256xf32> -> vector<32x512xf32>
    %cst_37 = arith.constant dense<0.000000e+00> : vector<8x512xf32>
    %130 = tpu.matmul %3, %129, %cst_37 {dimension_numbers = #tpu.dot_dimension_numbers<[1], [0], [0], [1], [0, 0, 1, 1], [], []>} : vector<8x32xf32>, vector<32x512xf32>, vector<8x512xf32> -> vector<8x512xf32>
    %131 = vector.broadcast %10 : vector<8x1xf32> to vector<8x512xf32>
    %132 = arith.addf %130, %131 : vector<8x512xf32>
    %133 = arith.addf %132, %0 : vector<8x512xf32>
    %c0_38 = arith.constant 0 : index
    %c0_39 = arith.constant 0 : index
    %134 = vector.load %arg4[%c0_38, %c0_39] : memref<8x512xf32, #tpu.memory_space<vmem>>, vector<8x512xf32>
    tpu.vector_store %arg4[%c0_38, %c0_39], %133 {strides = array<i32>} : memref<8x512xf32, #tpu.memory_space<vmem>>, vector<8x512xf32>,
    return
  }
  func.func @transform_0(%arg0: i32) -> (i32, i32) {
    %c0_i32 = arith.constant 0 : i32
    %c0_i32_0 = arith.constant 0 : i32
    return %c0_i32, %arg0 : i32, i32
  }
  func.func @transform_1(%arg0: i32) -> (i32, i32, i32) {
    %c0_i32 = arith.constant 0 : i32
    %c0_i32_0 = arith.constant 0 : i32
    %c0_i32_1 = arith.constant 0 : i32
    %c0_i32_2 = arith.constant 0 : i32
    return %c0_i32, %c0_i32_0, %c0_i32_1 : i32, i32, i32
  }
  func.func @transform_2(%arg0: i32) -> (i32, i32) {
    %c0_i32 = arith.constant 0 : i32
    %c0_i32_0 = arith.constant 0 : i32
    %c0_i32_1 = arith.constant 0 : i32
    return %c0_i32, %c0_i32_0 : i32, i32
  }
  func.func @transform_3(%arg0: i32) -> (i32, i32) {
    %c0_i32 = arith.constant 0 : i32
    %c0_i32_0 = arith.constant 0 : i32
    return %c0_i32, %arg0 : i32, i32
  }
}

</mosaic_0001>

<bundles_post_ra>
// kernel: forward.1
= control target key start
LH: loop header
LB: loop body
LE: loop exit
PB: predicated region body
PF: predicated region fallthrough
CT: control target
= control target key end

     0   :  { %8 = vsyncpa [#allocation3], 0  ;;  %s2072_s12 = smov [#allocation2]   ;;  %s3337_s0 = inlined_call_operand.vmem [shape: f32[8,512], index: 0, kind: input, shape index: {}]   ;;  %s3338_s1 = inlined_call_operand.hbm [shape: f32[9,32,512], index: 1, kind: input, shape index: {}]   ;;  %s3339_s2 = inlined_call_operand.vmem [shape: f32[32,128], index: 2, kind: input, shape index: {}]   ;;  %s3340_s3 = inlined_call_operand.vmem [shape: f32[8,512], index: 3, kind: output, shape index: {}]  }
   0x1   :  { %s16_s13 = sshll.u32 %s2072_s12, 4  ;;  %s2048_s16 = scalar_lea.hbm %s3338_s1, 18432  ;;  %s17_s13 = int_to_ptr.vmem [resolvable:$true] %s16_s13 }
   0x2   :  { %p2049_p0 = scmp.ne.s32.totalorder %s3338_s1, %s2048_s16  ;;  %p2052_p1 = scmp.lt.u32.totalorder %s2048_s16, %s3338_s1 }
   0x4   :  { %p2054_p2 = pnand %p2052_p1, %p2049_p0 }
   0x6   :  { %2057 = shalt.err (!%p2054_p2)
}
   0x7   :  { %s2058_s21 = scalar_lea.vmem %s17_s13, 18432  ;;  %p2063_p4 = scmp.lt.s32.totalorder %s17_s13, %s17_s13 }
   0x8   :  { %p2059_p3 = scmp.ne.s32.totalorder %s17_s13, %s2058_s21  ;;  %p2064_p5 = scmp.lt.s32.totalorder %s2058_s21, %s2058_s21 }
   0xa   :  { %p2065_p6 = por %p2064_p5, %p2063_p4 }
   0xc   :  { %p2066_p7 = pnand %p2065_p6, %p2059_p3 }
   0xe   :  { %2069 = shalt.err (!%p2066_p7)
}
   0xf   :  { %s2073_s22 = smov 512   ;;  %s2074_s23 = smov 32  }
  0x10   :  { %22 = dma.hbm_to_vmem [thread:$0]  %s3338_s1, 18432, %s17_s13, [#allocation3], %s2073_s22, %s2073_s22, %s2074_s23  }
  0x11   :  { %2070 = dma.done.wait [#allocation3], 18432  }
  0x12   :  { %2071 = vsyncadd [#allocation3], 4294948864  ;;  %v2075_v0 = vmov 0.0   ;;  %v2076_v1 = vmov 46   ;;  %v29_v2 = vld [vmem:[%s3337_s0 + $0x8] sm:$0xff]  ;;  %v31_v3 = vld [vmem:[%s3337_s0 + $0x18] sm:$0xff] }
  0x13   :  { %129 = vmatprep.mubr.f32.mxu0 %v2075_v0  ;;  %218 = vmatprep.mubr.f32.mxu1 %v2075_v0  ;;  %v28_v4 = vld [vmem:[%s3337_s0] sm:$0xff]  ;;  %vm56_vm0 = vcmask 64512   ;;  %v30_v5 = vld [vmem:[%s3337_s0 + $0x10] sm:$0xff]  ;;  %v33_v7 = vld [vmem:[%s3339_s2 + $0x8] sm:$0xff]  ;;  %v2077_v10 = vmov 47   ;;  %s2078_s14 = smov 111  }
  0x14   :  { %1864 = vset.pattern.permute.xlu0 %v2076_v1  ;;  %1865 = vset.pattern.permute.xlu1 %v2076_v1  ;;  %v32_v6 = vld [vmem:[%s3339_s2] sm:$0xff]  ;;  %v34_v8 = vld [vmem:[%s3339_s2 + $0x10] sm:$0xff]  ;;  %v35_v9 = vld [vmem:[%s3339_s2 + $0x18] sm:$0xff]  ;;  %s2079_s15 = smov 17   ;;  %s2080_s16 = smov 16   ;;  %vm1353_vm9 = vcmask 343360  }
  0x15   :  { %65 = vmatprep.subr.mxu0 %v29_v2  ;;  %154 = vmatprep.subr.mxu1 %v31_v3  ;;  %s2081_s17 = smov 15   ;;  %s2082_s18 = smov 1   ;;  %vm1406_vm10 = vcmask 15360   ;;  %vm1618_vm11 = vcmask 261120  }
  0x16   :  { %66 = vmatpush1.msra.mxu0 %v28_v4  ;;  %155 = vmatpush1.msra.mxu1 %v30_v5  ;;  %s2083_s19 = smov 127   ;;  %s2084_s20 = smov 113  }
  0x17   :  { %1776 = vmatmul.mubr.msk.f32.vlgmr.msra.gmra.mrb[0].mxu0 %vm56_vm0, %v32_v6  ;;  %1780 = vmatmul.mubr.msk.f32.vlgmr.msra.gmra.mrb[0].mxu1 %vm56_vm0, %v32_v6  ;;  %s2085_s21 = smov 112   ;;  %s2086_s24 = smov 124  }
  0x18   :  { %135 = vmatprep.mubr.f32.mxu0 %v2075_v0  ;;  %224 = vmatprep.mubr.f32.mxu1 %v2075_v0  ;;  %s2088_s4 = smov 86   ;;  %s2090_s1 = smov 120  }
  0x19   :  { %38 = vperm.xlu0 %1864, %v32_v6   ;;  %48 = vperm.xlu1 %1865, %v34_v8  }
  0x1b   :  { %1777 = vmatmul.mubr.msk.f32.gmra.mrb[2].mxu0 %vm56_vm0, %v33_v7  ;;  %1781 = vmatmul.mubr.msk.f32.gmra.mrb[2].mxu1 %vm56_vm0, %v33_v7 }
  0x1c   :  { %141 = vmatprep.mubr.f32.mxu0 %v2075_v0  ;;  %230 = vmatprep.mubr.f32.mxu1 %v2075_v0 }
  0x1d   :  { %43 = vperm.xlu0 %1864, %v33_v7   ;;  %53 = vperm.xlu1 %1865, %v35_v9  }
  0x1f   :  { %1778 = vmatmul.mubr.msk.f32.gmra.mrb[4].mxu0 %vm56_vm0, %v34_v8  ;;  %1782 = vmatmul.mubr.msk.f32.gmra.mrb[4].mxu1 %vm56_vm0, %v34_v8 }
  0x20   :  { %147 = vmatprep.mubr.f32.mxu0 %v2075_v0  ;;  %236 = vmatprep.mubr.f32.mxu1 %v2075_v0 }
  0x21   :  { %1867 = vset.pattern.permute.xlu1 %v2077_v10  ;;  %1866 = vset.pattern.permute.xlu0 %v2077_v10 }
  0x22   :  { %1194 = vperm.xlu1 %1867, %v33_v7   ;;  %1190 = vperm.xlu0 %1866, %v32_v6  }
  0x23   :  { %1779 = vmatmul.mubr.msk.f32.gmra.mrb[6].mxu0 %vm56_vm0, %v35_v9  ;;  %1783 = vmatmul.mubr.msk.f32.gmra.mrb[6].mxu1 %vm56_vm0, %v35_v9 }
  0x24   :  { %1685 = vmatprep.mubr.f32.mxu0 %v2075_v0  ;;  %1756 = vmatprep.mubr.f32.mxu1 %v2075_v0 }
  0x26   :  { %1198 = vperm.xlu1 %1867, %v34_v8   ;;  %1202 = vperm.xlu0 %1866, %v35_v9  }
  0x98   :  { %v39_v11 = vpop.permute.xlu0 %38 }
  0x9c   :  { %v2160_v27 = vpop.permute.xlu0 %43 }
  0xea   :  { %v131_v12 = vpop.f32.mrb[0].mxu0  ;;  %v220_v13 = vpop.f32.mrb[0].mxu1 }
  0xeb   :  { %v132_v14 = vadd.f32 %v131_v12, %v39_v11  ;;  %v221_v15 = vadd.f32 %v220_v13, %v39_v11  ;;  %v133_v16 = vpop.f32.mrb[1].mxu0  ;;  %v222_v17 = vpop.f32.mrb[1].mxu1 }
  0xec   :  { %v134_v18 = vadd.f32 %v133_v16, %v39_v11  ;;  %v223_v21 = vadd.f32 %v222_v17, %v39_v11  ;;  %v49_v13 = vpop.permute.xlu1 %48 }
  0xed   :  { %v1784_v19 = vmul.f32 -1.442695, %v132_v14  ;;  %v1786_v20 = vmul.f32 -1.442695, %v221_v15 }
  0xee   :  { %v1785_v22 = vmul.f32 -1.442695, %v134_v18  ;;  %v137_v23 = vpop.f32.mrb[2].mxu0  ;;  %v226_v24 = vpop.f32.mrb[2].mxu1  ;;  %v1787_v28 = vmul.f32 -1.442695, %v223_v21 }
  0xef   :  { %1872 = vpow2.f32 %v1784_v19  ;;  %v2156_v25 = vpop.f32.mrb[3].mxu0  ;;  %v2158_v26 = vpop.f32.mrb[3].mxu1  ;;  %v138_v29 = vadd.f32 %v137_v23, %v2160_v27  ;;  %v227_v35 = vadd.f32 %v226_v24, %v2160_v27 }
  0xf0   :  { %1874 = vpow2.f32 %v1786_v20  ;;  %v140_v1 = vadd.f32 %v2156_v25, %v2160_v27  ;;  %v229_v3 = vadd.f32 %v2158_v26, %v2160_v27 }
  0xf1   :  { %1876 = vpow2.f32 %v1785_v22  ;;  %v1788_v34 = vmul.f32 -1.442695, %v138_v29  ;;  %v1790_v41 = vmul.f32 -1.442695, %v227_v35  ;;  %v2310_v22 = vpop.permute.xlu0 %1190 }
  0xf2   :  { %v2163_v30 = vpop.f32.mrb[4].mxu0  ;;  %v2165_v31 = vpop.f32.mrb[4].mxu1  ;;  %1878 = vpow2.f32 %v1787_v28  ;;  %v1789_v2 = vmul.f32 -1.442695, %v140_v1  ;;  %v1791_v4 = vmul.f32 -1.442695, %v229_v3 }
  0xf3   :  { %v2167_v32 = vpop.f32.mrb[5].mxu0  ;;  %v2169_v33 = vpop.f32.mrb[5].mxu1  ;;  %1880 = vpow2.f32 %v1788_v34  ;;  %v233_v16 = vadd.f32 %v2165_v31, %v49_v13  ;;  %3357 = vst [vmem:[#allocation5_spill] sm:$0xff] %v2310_v22 }
  0xf4   :  { %v235_v20 = vadd.f32 %v2169_v33, %v49_v13 }
  0xf5   :  { %v1794_v17 = vmul.f32 -1.442695, %v233_v16  ;;  %v2322_v26 = vpop.permute.xlu0 %1202 }
  0xf6   :  { %v2172_v36 = vpop.f32.mrb[6].mxu0  ;;  %v2174_v37 = vpop.f32.mrb[6].mxu1  ;;  %v1795_v23 = vmul.f32 -1.442695, %v235_v20  ;;  %3359 = vst [vmem:[#allocation7_spill] sm:$0xff] %v2322_v26 }
  0xf7   :  { %v2176_v38 = vpop.f32.mrb[7].mxu0  ;;  %v2178_v39 = vpop.f32.mrb[7].mxu1 }
  0xf9   :  { %v1873_v40 = vpop.eup %1872 }
  0xfa   :  { %v1875_v42 = vpop.eup %1874  ;;  %v291_v43 = vadd.f32 1.0, %v1873_v40 }
  0xfb   :  { %v1877_v44 = vpop.eup %1876  ;;  %v293_v45 = vadd.f32 1.0, %v1875_v42 }
  0xfc   :  { %1882 = vrcp.f32 %v291_v43  ;;  %v292_v46 = vadd.f32 1.0, %v1877_v44  ;;  %v1879_v47 = vpop.eup %1878 }
  0xfd   :  { %1884 = vpow2.f32 %v1790_v41  ;;  %v294_v48 = vadd.f32 1.0, %v1879_v47  ;;  %v1881_v49 = vpop.eup %1880 }
  0xfe   :  { %1886 = vrcp.f32 %v293_v45  ;;  %v295_v51 = vadd.f32 1.0, %v1881_v49 }
  0xff   :  { %1888 = vrcp.f32 %v292_v46 }
 0x100   :  { %1890 = vrcp.f32 %v294_v48 }
 0x101   :  { %1892 = vrcp.f32 %v295_v51 }
 0x106   :  { %v1883_v50 = vpop.eup %1882 }
 0x107   :  { %v1885_v52 = vpop.eup %1884  ;;  %v2180_v53 = vmul.f32 %v1883_v50, %v132_v14  ;;  %v144_v14 = vadd.f32 %v2163_v30, %v49_v13 }
 0x108   :  { %v1887_v54 = vpop.eup %1886  ;;  %v297_v55 = vadd.f32 1.0, %v1885_v52 }
 0x109   :  { %1091 = vrot.lane.b32.xlu1 %v2180_v53, %s2078_s14  ;;  %355 = vrot.lane.b32.xlu0 %v2180_v53, %s2079_s15  ;;  %v2186_v56 = vmul.f32 %v1887_v54, %v221_v15  ;;  %v1889_v57 = vpop.eup %1888  ;;  %v1792_v15 = vmul.f32 -1.442695, %v144_v14 }
 0x10a   :  { %1894 = vrcp.f32 %v297_v55  ;;  %v2192_v58 = vmul.f32 %v1889_v57, %v134_v18  ;;  %v1891_v59 = vpop.eup %1890  ;;  %v146_v18 = vadd.f32 %v2167_v32, %v49_v13 }
 0x10b   :  { %v2198_v60 = vmul.f32 %v1891_v59, %v223_v21  ;;  %v1893_v61 = vpop.eup %1892  ;;  %1896 = vpow2.f32 %v1789_v2  ;;  %v2304_v21 = vpop.permute.xlu1 %53 }
 0x10c   :  { %v2204_v62 = vmul.f32 %v1893_v61, %v138_v29  ;;  %1898 = vpow2.f32 %v1791_v4  ;;  %v1793_v19 = vmul.f32 -1.442695, %v146_v18  ;;  %v2428_v13 = vadd.f32 %v2176_v38, %v2304_v21 }
 0x10d   :  { %1107 = vrot.lane.b32.xlu1 %v2186_v56, %s2078_s14  ;;  %371 = vrot.lane.b32.xlu0 %v2186_v56, %s2079_s15 }
 0x10e   :  { %v1797_v38 = vmul.f32 -1.442695, %v2428_v13 }
 0x10f   :  { %v2312_v24 = vpop.permute.xlu1 %1194 }
 0x110   :  { %3358 = vst [vmem:[#allocation6_spill] sm:$0xff] %v2312_v24 }
 0x111   :  { %1099 = vrot.lane.b32.xlu1 %v2192_v58, %s2078_s14  ;;  %454 = vrot.lane.b32.xlu0 %v2180_v53, %s2080_s16 }
 0x113   :  { %v2324_v29 = vpop.permute.xlu1 %1198 }
 0x114   :  { %v1895_v63 = vpop.eup %1894  ;;  %3360 = vst [vmem:[#allocation8_spill] sm:$0xff] %v2324_v29  ;;  %v752_v29 = vld [vmem:[#allocation2 + $0x218] sm:$0xff] }
 0x115   :  { %1115 = vrot.lane.b32.xlu1 %v2198_v60, %s2078_s14  ;;  %470 = vrot.lane.b32.xlu0 %v2186_v56, %s2080_s16  ;;  %v2210_v0 = vmul.f32 %v1895_v63, %v227_v35  ;;  %v1897_v5 = vpop.eup %1896 }
 0x116   :  { %v296_v6 = vadd.f32 1.0, %v1897_v5  ;;  %v1899_v7 = vpop.eup %1898 }
 0x117   :  { %v298_v8 = vadd.f32 1.0, %v1899_v7 }
 0x118   :  { %1900 = vrcp.f32 %v296_v6 }
 0x119   :  { %357 = vrot.lane.b32.xlu1 %v2204_v62, %s2079_s15  ;;  %552 = vrot.lane.b32.xlu0 %v2180_v53, %s2081_s17  ;;  %1902 = vrcp.f32 %v298_v8 }
 0x11a   :  { %1904 = vpow2.f32 %v1792_v15 }
 0x11b   :  { %1906 = vpow2.f32 %v1794_v17 }
 0x11c   :  { %1908 = vpow2.f32 %v1793_v19 }
 0x11d   :  { %373 = vrot.lane.b32.xlu1 %v2210_v0, %s2079_s15  ;;  %568 = vrot.lane.b32.xlu0 %v2186_v56, %s2081_s17  ;;  %1910 = vpow2.f32 %v1795_v23 }
 0x121   :  { %456 = vrot.lane.b32.xlu1 %v2204_v62, %s2080_s16  ;;  %650 = vrot.lane.b32.xlu0 %v2180_v53, %s2082_s18 }
 0x122   :  { %v1901_v9 = vpop.eup %1900 }
 0x123   :  { %v2268_v10 = vmul.f32 %v1901_v9, %v140_v1  ;;  %v1903_v11 = vpop.eup %1902  ;;  %v2416_v9 = vadd.f32 %v2172_v36, %v2304_v21  ;;  %v2436_v36 = vadd.f32 %v2178_v39, %v2304_v21 }
 0x124   :  { %v2274_v12 = vmul.f32 %v1903_v11, %v229_v3  ;;  %v1905_v25 = vpop.eup %1904  ;;  %v2424_v11 = vadd.f32 %v2174_v37, %v2304_v21 }
 0x125   :  { %472 = vrot.lane.b32.xlu1 %v2210_v0, %s2080_s16  ;;  %666 = vrot.lane.b32.xlu0 %v2186_v56, %s2082_s18  ;;  %v299_v27 = vadd.f32 1.0, %v1905_v25  ;;  %v1907_v28 = vpop.eup %1906  ;;  %v1799_v19 = vmul.f32 -1.442695, %v2436_v36 }
 0x126   :  { %v301_v30 = vadd.f32 1.0, %v1907_v28  ;;  %v1909_v31 = vpop.eup %1908  ;;  %v1798_v37 = vmul.f32 -1.442695, %v2424_v11 }
 0x127   :  { %1912 = vrcp.f32 %v299_v27  ;;  %v300_v34 = vadd.f32 1.0, %v1909_v31  ;;  %v1911_v35 = vpop.eup %1910 }
 0x128   :  { %1914 = vrcp.f32 %v301_v30  ;;  %v302_v42 = vadd.f32 1.0, %v1911_v35 }
 0x129   :  { %554 = vrot.lane.b32.xlu1 %v2204_v62, %s2081_s17  ;;  %797 = vrot.lane.b32.xlu0 %v2180_v53, %s2083_s19  ;;  %1916 = vrcp.f32 %v300_v34 }
 0x12a   :  { %1918 = vrcp.f32 %v302_v42 }
 0x12d   :  { %570 = vrot.lane.b32.xlu1 %v2210_v0, %s2081_s17  ;;  %813 = vrot.lane.b32.xlu0 %v2186_v56, %s2083_s19 }
 0x131   :  { %652 = vrot.lane.b32.xlu1 %v2204_v62, %s2082_s18  ;;  %895 = vrot.lane.b32.xlu0 %v2180_v53, %s2084_s20  ;;  %v1913_v45 = vpop.eup %1912 }
 0x132   :  { %v2354_v46 = vmul.f32 %v1913_v45, %v144_v14  ;;  %v1915_v49 = vpop.eup %1914 }
 0x133   :  { %v2364_v50 = vmul.f32 %v1915_v49, %v233_v16  ;;  %v1917_v54 = vpop.eup %1916  ;;  %v1796_v16 = vmul.f32 -1.442695, %v2416_v9 }
 0x134   :  { %3361 = vst [vmem:[#allocation9_spill] sm:$0xff] %v2354_v46  ;;  %v2374_v55 = vmul.f32 %v1917_v54, %v146_v18  ;;  %v1919_v61 = vpop.eup %1918 }
 0x135   :  { %668 = vrot.lane.b32.xlu1 %v2210_v0, %s2082_s18  ;;  %911 = vrot.lane.b32.xlu0 %v2186_v56, %s2084_s20  ;;  %3362 = vst [vmem:[#allocation10_spill] sm:$0xff] %v2364_v50  ;;  %v2384_v63 = vmul.f32 %v1919_v61, %v235_v20  ;;  %1920 = vpow2.f32 %v1796_v16 }
 0x136   :  { %3363 = vst [vmem:[#allocation11_spill] sm:$0xff] %v2374_v55  ;;  %1922 = vpow2.f32 %v1798_v37 }
 0x137   :  { %3364 = vst [vmem:[#allocation12_spill] sm:$0xff] %v2384_v63  ;;  %1924 = vpow2.f32 %v1797_v38  ;;  %v3346_v38 = vlaneseq }
 0x138   :  { %1926 = vpow2.f32 %v1799_v19 }
 0x139   :  { %799 = vrot.lane.b32.xlu1 %v2204_v62, %s2083_s19  ;;  %993 = vrot.lane.b32.xlu0 %v2180_v53, %s2085_s21 }
 0x13d   :  { %815 = vrot.lane.b32.xlu1 %v2210_v0, %s2083_s19  ;;  %1009 = vrot.lane.b32.xlu0 %v2186_v56, %s2085_s21 }
 0x13f   :  { %v1921_v25 = vpop.eup %1920 }
 0x140   :  { %v1923_v30 = vpop.eup %1922  ;;  %v303_v35 = vadd.f32 1.0, %v1921_v25 }
 0x141   :  { %897 = vrot.lane.b32.xlu1 %v2204_v62, %s2084_s20  ;;  %363 = vrot.lane.b32.xlu0 %v2192_v58, %s2079_s15  ;;  %v1925_v31 = vpop.eup %1924  ;;  %v305_v42 = vadd.f32 1.0, %v1923_v30  ;;  %v2501_v30 = vand.u32 127, %v3346_v38  ;;  %v754_v38 = vld [vmem:[#allocation2 + $0x228] sm:$0xff] }
 0x142   :  { %v1927_v34 = vpop.eup %1926  ;;  %v304_v54 = vadd.f32 1.0, %v1925_v31  ;;  %1928 = vrcp.f32 %v303_v35 }
 0x143   :  { %v306_v61 = vadd.f32 1.0, %v1927_v34  ;;  %1930 = vrcp.f32 %v305_v42  ;;  %v749_v42 = vld [vmem:[#allocation2 + $0x200] sm:$0xff]  ;;  %vm1123_vm1 = vcmp.lt.s32.totalorder %v2501_v30, 111  ;;  %vm486_vm2 = vcmp.lt.s32.totalorder %v2501_v30, 16 }
 0x144   :  { %1932 = vrcp.f32 %v304_v54  ;;  %v750_v54 = vld [vmem:[#allocation2 + $0x208] sm:$0xff]  ;;  %vm389_vm3 = vcmp.lt.s32.totalorder %v2501_v30, 17  ;;  %vm584_vm4 = vcmp.lt.s32.totalorder %v2501_v30, 15  ;;  %vm682_vm5 = vcmp.lt.s32.totalorder %v2501_v30, 1 }
 0x145   :  { %913 = vrot.lane.b32.xlu1 %v2210_v0, %s2084_s20  ;;  %379 = vrot.lane.b32.xlu0 %v2198_v60, %s2079_s15  ;;  %1934 = vrcp.f32 %v306_v61  ;;  %v751_v61 = vld [vmem:[#allocation2 + $0x210] sm:$0xff]  ;;  %vm829_vm6 = vcmp.lt.s32.totalorder %v2501_v30, 127  ;;  %vm927_vm7 = vcmp.lt.s32.totalorder %v2501_v30, 113  ;;  %vm1025_vm8 = vcmp.lt.s32.totalorder %v2501_v30, 112 }
 0x149   :  { %995 = vrot.lane.b32.xlu1 %v2204_v62, %s2085_s21  ;;  %462 = vrot.lane.b32.xlu0 %v2192_v58, %s2080_s16 }
 0x14c   :  { %v1929_v35 = vpop.eup %1928 }
 0x14d   :  { %1011 = vrot.lane.b32.xlu1 %v2210_v0, %s2085_s21  ;;  %478 = vrot.lane.b32.xlu0 %v2198_v60, %s2080_s16  ;;  %v1931_v26 = vpop.eup %1930 }
 0x14e   :  { %v1933_v24 = vpop.eup %1932 }
 0x14f   :  { %v1935_v22 = vpop.eup %1934 }
 0x151   :  { %365 = vrot.lane.b32.xlu1 %v2268_v10, %s2079_s15  ;;  %560 = vrot.lane.b32.xlu0 %v2192_v58, %s2081_s17 }
 0x155   :  { %381 = vrot.lane.b32.xlu1 %v2274_v12, %s2079_s15  ;;  %576 = vrot.lane.b32.xlu0 %v2198_v60, %s2081_s17 }
 0x159   :  { %464 = vrot.lane.b32.xlu1 %v2268_v10, %s2080_s16  ;;  %658 = vrot.lane.b32.xlu0 %v2192_v58, %s2082_s18 }
 0x15d   :  { %480 = vrot.lane.b32.xlu1 %v2274_v12, %s2080_s16  ;;  %674 = vrot.lane.b32.xlu0 %v2198_v60, %s2082_s18 }
 0x161   :  { %562 = vrot.lane.b32.xlu1 %v2268_v10, %s2081_s17  ;;  %805 = vrot.lane.b32.xlu0 %v2192_v58, %s2083_s19 }
 0x165   :  { %578 = vrot.lane.b32.xlu1 %v2274_v12, %s2081_s17  ;;  %821 = vrot.lane.b32.xlu0 %v2198_v60, %s2083_s19 }
 0x169   :  { %660 = vrot.lane.b32.xlu1 %v2268_v10, %s2082_s18  ;;  %903 = vrot.lane.b32.xlu0 %v2192_v58, %s2084_s20 }
 0x16d   :  { %676 = vrot.lane.b32.xlu1 %v2274_v12, %s2082_s18  ;;  %919 = vrot.lane.b32.xlu0 %v2198_v60, %s2084_s20 }
 0x171   :  { %807 = vrot.lane.b32.xlu1 %v2268_v10, %s2083_s19  ;;  %1001 = vrot.lane.b32.xlu0 %v2192_v58, %s2085_s21 }
 0x175   :  { %823 = vrot.lane.b32.xlu1 %v2274_v12, %s2083_s19  ;;  %1017 = vrot.lane.b32.xlu0 %v2198_v60, %s2085_s21 }
 0x179   :  { %905 = vrot.lane.b32.xlu1 %v2268_v10, %s2084_s20  ;;  %1093 = vrot.lane.b32.xlu0 %v2204_v62, %s2078_s14 }
 0x17b   :  { %v2330_v32 = vpop.permute.xlu1 %1091  ;;  %v2332_v33 = vpop.permute.xlu0 %355 }
 0x17d   :  { %921 = vrot.lane.b32.xlu1 %v2274_v12, %s2084_s20  ;;  %1109 = vrot.lane.b32.xlu0 %v2210_v0, %s2078_s14 }
 0x17f   :  { %v2338_v40 = vpop.permute.xlu1 %1107  ;;  %v2340_v41 = vpop.permute.xlu0 %371 }
 0x181   :  { %1003 = vrot.lane.b32.xlu1 %v2268_v10, %s2085_s21  ;;  %1101 = vrot.lane.b32.xlu0 %v2268_v10, %s2078_s14 }
 0x183   :  { %v2346_v43 = vpop.permute.xlu1 %1099  ;;  %v2348_v44 = vpop.permute.xlu0 %454 }
 0x185   :  { %1019 = vrot.lane.b32.xlu1 %v2274_v12, %s2085_s21  ;;  %1117 = vrot.lane.b32.xlu0 %v2274_v12, %s2078_s14 }
 0x187   :  { %v2356_v47 = vpop.permute.xlu1 %1115  ;;  %v2358_v48 = vpop.permute.xlu0 %470 }
 0x189   :  { %997 = vrot.lane.b32.xlu1 %v2354_v46, %s2085_s21  ;;  %359 = vrot.lane.b32.xlu0 %v2354_v46, %s2079_s15 }
 0x18b   :  { %v2366_v51 = vpop.permute.xlu1 %357  ;;  %v2368_v52 = vpop.permute.xlu0 %552 }
 0x18d   :  { %1013 = vrot.lane.b32.xlu1 %v2364_v50, %s2085_s21  ;;  %375 = vrot.lane.b32.xlu0 %v2364_v50, %s2079_s15 }
 0x18f   :  { %v2376_v57 = vpop.permute.xlu1 %373  ;;  %v2378_v59 = vpop.permute.xlu0 %568 }
 0x191   :  { %367 = vrot.lane.b32.xlu1 %v2374_v55, %s2079_s15  ;;  %458 = vrot.lane.b32.xlu0 %v2354_v46, %s2080_s16 }
 0x193   :  { %v2386_v1 = vpop.permute.xlu1 %456  ;;  %v2388_v2 = vpop.permute.xlu0 %650 }
 0x195   :  { %383 = vrot.lane.b32.xlu1 %v2384_v63, %s2079_s15  ;;  %474 = vrot.lane.b32.xlu0 %v2364_v50, %s2080_s16 }
 0x197   :  { %v2394_v3 = vpop.permute.xlu1 %472  ;;  %v2396_v4 = vpop.permute.xlu0 %666 }
 0x199   :  { %466 = vrot.lane.b32.xlu1 %v2374_v55, %s2080_s16  ;;  %556 = vrot.lane.b32.xlu0 %v2354_v46, %s2081_s17 }
 0x19b   :  { %v2402_v5 = vpop.permute.xlu1 %554  ;;  %v2404_v6 = vpop.permute.xlu0 %797 }
 0x19d   :  { %482 = vrot.lane.b32.xlu1 %v2384_v63, %s2080_s16  ;;  %572 = vrot.lane.b32.xlu0 %v2364_v50, %s2081_s17 }
 0x19f   :  { %v2410_v7 = vpop.permute.xlu1 %570  ;;  %v2412_v8 = vpop.permute.xlu0 %813 }
 0x1a1   :  { %564 = vrot.lane.b32.xlu1 %v2374_v55, %s2081_s17  ;;  %654 = vrot.lane.b32.xlu0 %v2354_v46, %s2082_s18 }
 0x1a3   :  { %v2430_v14 = vpop.permute.xlu1 %652  ;;  %v2432_v15 = vpop.permute.xlu0 %895 }
 0x1a5   :  { %580 = vrot.lane.b32.xlu1 %v2384_v63, %s2081_s17  ;;  %670 = vrot.lane.b32.xlu0 %v2364_v50, %s2082_s18 }
 0x1a7   :  { %v2445_v17 = vpop.permute.xlu1 %668  ;;  %v2447_v18 = vpop.permute.xlu0 %911 }
 0x1a9   :  { %662 = vrot.lane.b32.xlu1 %v2374_v55, %s2082_s18  ;;  %801 = vrot.lane.b32.xlu0 %v2354_v46, %s2083_s19 }
 0x1ab   :  { %v2454_v39 = vpop.permute.xlu1 %799  ;;  %v2456_v20 = vpop.permute.xlu0 %993 }
 0x1ac   :  { %3365 = vst [vmem:[#allocation13_spill] sm:$0xff] %v2454_v39  ;;  %3366 = vst [vmem:[#allocation14_spill] sm:$0xff] %v2456_v20  ;;  %v2524_v39 = vmul.f32 %v751_v61, %v2186_v56  ;;  %v1141_v20 = vld [vmem:[#allocation2 + $0x400] sm:$0xff]  ;;  %v2546_v56 = vmul.f32 %v754_v38, %v2268_v10  ;;  %v1142_v10 = vld [vmem:[#allocation2 + $0x408] sm:$0xff] }
 0x1ad   :  { %678 = vrot.lane.b32.xlu1 %v2384_v63, %s2082_s18  ;;  %817 = vrot.lane.b32.xlu0 %v2364_v50, %s2083_s19  ;;  %v406_v61 = vld [vmem:[#allocation2] sm:$0xff] }
 0x1ae   :  { %3373 = vst [vmem:[#allocation21_spill] sm:$0xff] %v2546_v56  ;;  %v507_v56 = vld [vmem:[#allocation2 + $0x98] sm:$0xff] }
 0x1af   :  { %v2462_v21 = vpop.permute.xlu1 %815  ;;  %v2464_v23 = vpop.permute.xlu0 %1009 }
 0x1b0   :  { %3367 = vst [vmem:[#allocation15_spill] sm:$0xff] %v2462_v21  ;;  %v2530_v21 = vmul.f32 %v752_v29, %v2198_v60  ;;  %v2552_v60 = vmul.f32 %v1931_v26, %v2424_v11  ;;  %v505_v29 = vld [vmem:[#allocation2 + $0x88] sm:$0xff]  ;;  %v506_v26 = vld [vmem:[#allocation2 + $0x90] sm:$0xff] }
 0x1b1   :  { %809 = vrot.lane.b32.xlu1 %v2374_v55, %s2083_s19  ;;  %899 = vrot.lane.b32.xlu0 %v2354_v46, %s2084_s20  ;;  %v1143_v11 = vld [vmem:[#allocation2 + $0x410] sm:$0xff] }
 0x1b3   :  { %v2470_v27 = vpop.permute.xlu1 %897  ;;  %v2472_v28 = vpop.permute.xlu0 %363 }
 0x1b4   :  { %3368 = vst [vmem:[#allocation16_spill] sm:$0xff] %v2470_v27 }
 0x1b5   :  { %825 = vrot.lane.b32.xlu1 %v2384_v63, %s2083_s19  ;;  %915 = vrot.lane.b32.xlu0 %v2364_v50, %s2084_s20 }
 0x1b7   :  { %v2478_v45 = vpop.permute.xlu1 %913  ;;  %v2480_v49 = vpop.permute.xlu0 %379 }
 0x1b8   :  { %3369 = vst [vmem:[#allocation17_spill] sm:$0xff] %v2478_v45  ;;  %v2521_v45 = vmul.f32 %v749_v42, %v2180_v53  ;;  %v1132_v53 = vsel %vm1123_vm1, %v2330_v32, %v2346_v43  ;;  %v1136_v42 = vsel %vm1123_vm1, %v2356_v47, %v2330_v32  ;;  %v390_v32 = vsel %vm389_vm3, %v2340_v41, %v2480_v49 }
 0x1b9   :  { %907 = vrot.lane.b32.xlu1 %v2374_v55, %s2084_s20  ;;  %1095 = vrot.lane.b32.xlu0 %v2354_v46, %s2078_s14  ;;  %v755_v46 = vld [vmem:[#allocation2 + $0x230] sm:$0xff] }
 0x1bb   :  { %v2486_v16 = vpop.permute.xlu1 %995  ;;  %v463_v37 = vpop.permute.xlu0 %462 }
 0x1bc   :  { %3370 = vst [vmem:[#allocation18_spill] sm:$0xff] %v2486_v16  ;;  %v2513_v16 = vmul.f32 %v1929_v35, %v2416_v9  ;;  %v2536_v35 = vmul.f32 %v755_v46, %v2210_v0  ;;  %v2558_v0 = vmul.f32 %v1935_v22, %v2436_v36  ;;  %v495_v46 = vsel %vm486_vm2, %v2348_v44, %v463_v37 }
 0x1bd   :  { %923 = vrot.lane.b32.xlu1 %v2384_v63, %s2084_s20  ;;  %1111 = vrot.lane.b32.xlu0 %v2364_v50, %s2078_s14  ;;  %v753_v50 = vld [vmem:[#allocation2 + $0x220] sm:$0xff]  ;;  %v491_v22 = vsel %vm486_vm2, %v463_v37, %v2358_v48  ;;  %v398_v36 = vsel %vm389_vm3, %v2332_v33, %v2472_v28 }
 0x1be   :  { %v2533_v9 = vmul.f32 %v753_v50, %v2204_v62  ;;  %3372 = vst [vmem:[#allocation20_spill] sm:$0xff] %v2536_v35  ;;  %v2555_v62 = vmul.f32 %v1933_v24, %v2428_v13  ;;  %v407_v13 = vld [vmem:[#allocation2 + $0x8] sm:$0xff]  ;;  %v504_v37 = vld [vmem:[#allocation2 + $0x80] sm:$0xff] }
 0x1bf   :  { %v2492_v19 = vpop.permute.xlu1 %1011  ;;  %v2494_v25 = vpop.permute.xlu0 %478 }
 0x1c0   :  { %3371 = vst [vmem:[#allocation19_spill] sm:$0xff] %v2492_v19  ;;  %v499_v38 = vsel %vm486_vm2, %v2494_v25, %v2348_v44 }
 0x1c1   :  { %1103 = vrot.lane.b32.xlu1 %v2374_v55, %s2078_s14  ;;  %1005 = vrot.lane.b32.xlu0 %v2374_v55, %s2085_s21  ;;  %v756_v55 = vld [vmem:[#allocation2 + $0x238] sm:$0xff] }
 0x1c3   :  { %v2503_v31 = vpop.permute.xlu1 %365  ;;  %v2505_v34 = vpop.permute.xlu0 %560 }
 0x1c4   :  { %v593_v35 = vsel %vm584_vm4, %v2368_v52, %v2505_v34 }
 0x1c5   :  { %1119 = vrot.lane.b32.xlu1 %v2384_v63, %s2078_s14  ;;  %1021 = vrot.lane.b32.xlu0 %v2384_v63, %s2085_s21  ;;  %v2527_v63 = vmul.f32 %v750_v54, %v2192_v58  ;;  %v2549_v58 = vmul.f32 %v756_v55, %v2274_v12  ;;  %v1128_v12 = vsel %vm1123_vm1, %v2346_v43, %v2338_v40  ;;  %v408_v54 = vld [vmem:[#allocation2 + $0x10] sm:$0xff] }
 0x1c6   :  { %v2576_v55 = vmul.f32 %v1141_v20, %v1132_v53  ;;  %v1124_v43 = vsel %vm1123_vm1, %v2338_v40, %v2356_v47  ;;  %v1144_v20 = vld [vmem:[#allocation2 + $0x418] sm:$0xff]  ;;  %v394_v40 = vsel %vm389_vm3, %v2472_v28, %v2340_v41  ;;  %v402_v53 = vsel %vm389_vm3, %v2480_v49, %v2332_v33  ;;  %v603_v28 = vld [vmem:[#allocation2 + $0x108] sm:$0xff] }
 0x1c7   :  { %v2516_v19 = vpop.permute.xlu1 %381  ;;  %v2518_v27 = vpop.permute.xlu0 %576  ;;  %3374 = vst [vmem:[#allocation22_spill] sm:$0xff] %v2549_v58  ;;  %v2604_v44 = vmul.f32 %v1142_v10, %v1128_v12  ;;  %v409_v58 = vld [vmem:[#allocation2 + $0x18] sm:$0xff]  ;;  %v522_v47 = vmul.f32 %v506_v26, %v491_v22  ;;  %v2616_v33 = vmul.f32 %v1143_v11, %v1124_v43  ;;  %v604_v10 = vld [vmem:[#allocation2 + $0x110] sm:$0xff]  ;;  %v589_v41 = vsel %vm584_vm4, %v2505_v34, %v2378_v59 }
 0x1c8   :  { %3375 = vst [vmem:[#allocation23_spill] sm:$0xff] %v2576_v55  ;;  %v521_v55 = vmul.f32 %v505_v29, %v495_v46  ;;  %v423_v29 = vmul.f32 %v407_v13, %v398_v36  ;;  %v520_v46 = vmul.f32 %v504_v37, %v499_v38  ;;  %v2624_v26 = vmul.f32 %v1144_v20, %v1136_v42  ;;  %v701_v37 = vld [vmem:[#allocation2 + $0x188] sm:$0xff]  ;;  %v602_v42 = vld [vmem:[#allocation2 + $0x100] sm:$0xff] }
 0x1c9   :  { %901 = vrot.lane.b32.xlu1 %v2513_v16, %s2084_s20  ;;  %361 = vrot.lane.b32.xlu0 %v2513_v16, %s2079_s15  ;;  %3376 = vst [vmem:[#allocation24_spill] sm:$0xff] %v2604_v44  ;;  %3377 = vst [vmem:[#allocation25_spill] sm:$0xff] %v2616_v33  ;;  %v424_v22 = vmul.f32 %v408_v54, %v394_v40  ;;  %v422_v44 = vmul.f32 %v406_v61, %v402_v53  ;;  %v509_v53 = vld [vmem:[#allocation2 + $0xa8] sm:$0xff]  ;;  %v511_v33 = vld [vmem:[#allocation2 + $0xb8] sm:$0xff] }
 0x1ca   :  { %3378 = vst [vmem:[#allocation26_spill] sm:$0xff] %v2624_v26  ;;  %v487_v11 = vsel %vm486_vm2, %v2358_v48, %v2494_v25  ;;  %v425_v43 = vmul.f32 %v409_v58, %v390_v32  ;;  %v537_v13 = vadd.f32 %v521_v55, %v423_v29  ;;  %v619_v36 = vmul.f32 %v603_v28, %v593_v35  ;;  %v702_v48 = vld [vmem:[#allocation2 + $0x190] sm:$0xff]  ;;  %v411_v28 = vld [vmem:[#allocation2 + $0x28] sm:$0xff] }
 0x1cb   :  { %v2573_v24 = vpop.permute.xlu1 %464  ;;  %v659_v50 = vpop.permute.xlu0 %658  ;;  %v538_v38 = vadd.f32 %v522_v47, %v424_v22  ;;  %v620_v20 = vmul.f32 %v604_v10, %v589_v41  ;;  %v597_v54 = vsel %vm584_vm4, %v2518_v27, %v2368_v52  ;;  %v523_v35 = vmul.f32 %v507_v56, %v487_v11  ;;  %v700_v47 = vld [vmem:[#allocation2 + $0x180] sm:$0xff]  ;;  %v510_v10 = vld [vmem:[#allocation2 + $0xb0] sm:$0xff] }
 0x1cc   :  { %v691_v34 = vsel %vm682_vm5, %v2388_v2, %v659_v50  ;;  %v687_v25 = vsel %vm682_vm5, %v659_v50, %v2396_v4  ;;  %v536_v58 = vadd.f32 %v520_v46, %v422_v44  ;;  %v395_v55 = vsel %vm389_vm3, %v2503_v31, %v2376_v57  ;;  %v605_v50 = vld [vmem:[#allocation2 + $0x118] sm:$0xff]  ;;  %v412_v41 = vld [vmem:[#allocation2 + $0x30] sm:$0xff] }
 0x1cd   :  { %917 = vrot.lane.b32.xlu1 %v2552_v60, %s2084_s20  ;;  %377 = vrot.lane.b32.xlu0 %v2552_v60, %s2079_s15  ;;  %v399_v52 = vsel %vm389_vm3, %v2366_v51, %v2503_v31  ;;  %v585_v56 = vsel %vm584_vm4, %v2378_v59, %v2518_v27  ;;  %v496_v44 = vsel %vm486_vm2, %v2386_v1, %v2573_v24 }
 0x1ce   :  { %v717_v32 = vmul.f32 %v701_v37, %v691_v34  ;;  %v635_v29 = vadd.f32 %v619_v36, %v537_v13  ;;  %v618_v46 = vmul.f32 %v602_v42, %v597_v54  ;;  %v492_v59 = vsel %vm486_vm2, %v2573_v24, %v2394_v3  ;;  %v703_v13 = vld [vmem:[#allocation2 + $0x198] sm:$0xff]  ;;  %v410_v36 = vld [vmem:[#allocation2 + $0x20] sm:$0xff] }
 0x1cf   :  { %v2622_v49 = vpop.permute.xlu1 %480  ;;  %v675_v12 = vpop.permute.xlu0 %674  ;;  %v718_v27 = vmul.f32 %v702_v48, %v687_v25  ;;  %v636_v22 = vadd.f32 %v620_v20, %v538_v38  ;;  %v403_v11 = vsel %vm389_vm3, %v2516_v19, %v2366_v51  ;;  %v413_v37 = vld [vmem:[#allocation2 + $0x38] sm:$0xff]  ;;  %v621_v34 = vmul.f32 %v605_v50, %v585_v56  ;;  %v508_v20 = vld [vmem:[#allocation2 + $0xa0] sm:$0xff] }
 0x1d0   :  { %v695_v31 = vsel %vm682_vm5, %v675_v12, %v2388_v2  ;;  %v391_v2 = vsel %vm389_vm3, %v2376_v57, %v2516_v19  ;;  %v683_v24 = vsel %vm682_vm5, %v2396_v4, %v675_v12  ;;  %v525_v38 = vmul.f32 %v509_v53, %v496_v44 }
 0x1d1   :  { %1097 = vrot.lane.b32.xlu1 %v2513_v16, %s2078_s14  ;;  %460 = vrot.lane.b32.xlu0 %v2513_v16, %s2080_s16  ;;  %v500_v57 = vsel %vm486_vm2, %v2622_v49, %v2386_v1  ;;  %v716_v42 = vmul.f32 %v700_v47, %v695_v31  ;;  %v539_v54 = vadd.f32 %v523_v35, %v425_v43 }
 0x1d2   :  { %v427_v4 = vmul.f32 %v411_v28, %v399_v52  ;;  %v526_v12 = vmul.f32 %v510_v10, %v492_v59  ;;  %v733_v48 = vadd.f32 %v717_v32, %v635_v29  ;;  %v634_v25 = vadd.f32 %v618_v46, %v536_v58  ;;  %v607_v52 = vld [vmem:[#allocation2 + $0x128] sm:$0xff]  ;;  %v608_v29 = vld [vmem:[#allocation2 + $0x130] sm:$0xff]  ;;  %v847_v59 = vld [vmem:[#allocation2 + $0x280] sm:$0xff] }
 0x1d3   :  { %v563_v40 = vpop.permute.xlu1 %562  ;;  %v2653_v61 = vpop.permute.xlu0 %805  ;;  %v734_v26 = vadd.f32 %v718_v27, %v636_v22  ;;  %v488_v50 = vsel %vm486_vm2, %v2394_v3, %v2622_v49  ;;  %v719_v56 = vmul.f32 %v703_v13, %v683_v24  ;;  %v428_v1 = vmul.f32 %v412_v41, %v395_v55  ;;  %v848_v27 = vld [vmem:[#allocation2 + $0x288] sm:$0xff] }
 0x1d4   :  { %v426_v53 = vmul.f32 %v410_v36, %v403_v11  ;;  %v429_v44 = vmul.f32 %v413_v37, %v391_v2  ;;  %v524_v47 = vmul.f32 %v508_v20, %v500_v57  ;;  %v637_v43 = vadd.f32 %v621_v34, %v539_v54  ;;  %v606_v2 = vld [vmem:[#allocation2 + $0x120] sm:$0xff]  ;;  %v609_v11 = vld [vmem:[#allocation2 + $0x138] sm:$0xff]  ;;  %v705_v57 = vld [vmem:[#allocation2 + $0x1a8] sm:$0xff] }
 0x1d5   :  { %369 = vrot.lane.b32.xlu1 %v2555_v62, %s2079_s15  ;;  %476 = vrot.lane.b32.xlu0 %v2552_v60, %s2080_s16  ;;  %v541_v35 = vadd.f32 %v525_v38, %v427_v4  ;;  %v732_v58 = vadd.f32 %v716_v42, %v634_v25  ;;  %v594_v32 = vsel %vm584_vm4, %v2402_v5, %v563_v40  ;;  %v850_v36 = vld [vmem:[#allocation2 + $0x298] sm:$0xff]  ;;  %v706_v42 = vld [vmem:[#allocation2 + $0x1b0] sm:$0xff] }
 0x1d6   :  { %v542_v31 = vadd.f32 %v526_v12, %v428_v1  ;;  %v527_v28 = vmul.f32 %v511_v33, %v488_v50  ;;  %v590_v55 = vsel %vm584_vm4, %v563_v40, %v2410_v7  ;;  %v782_v46 = vadd.f32 %v2527_v63, %v733_v48  ;;  %v946_v48 = vld [vmem:[#allocation2 + $0x308] sm:$0xff]  ;;  %v704_v50 = vld [vmem:[#allocation2 + $0x1a0] sm:$0xff] }
 0x1d7   :  { %v579_v51 = vpop.permute.xlu1 %578  ;;  %v822_v19 = vpop.permute.xlu0 %821  ;;  %v735_v10 = vadd.f32 %v719_v56, %v637_v43  ;;  %v834_v41 = vsel %vm829_vm6, %v2653_v61, %v2412_v8  ;;  %v838_v33 = vsel %vm829_vm6, %v2404_v6, %v2653_v61  ;;  %v783_v22 = vadd.f32 %v2524_v39, %v734_v26  ;;  %v849_v61 = vld [vmem:[#allocation2 + $0x290] sm:$0xff] }
 0x1d8   :  { %v540_v63 = vadd.f32 %v524_v47, %v426_v53  ;;  %v623_v40 = vmul.f32 %v607_v52, %v594_v32  ;;  %v586_v13 = vsel %vm584_vm4, %v2410_v7, %v579_v51  ;;  %v598_v24 = vsel %vm584_vm4, %v579_v51, %v2402_v5  ;;  %v945_v32 = vld [vmem:[#allocation2 + $0x300] sm:$0xff] }
 0x1d9   :  { %385 = vrot.lane.b32.xlu1 %v2558_v0, %s2079_s15  ;;  %558 = vrot.lane.b32.xlu0 %v2513_v16, %s2081_s17  ;;  %v624_v39 = vmul.f32 %v608_v29, %v590_v55  ;;  %v781_v26 = vadd.f32 %v2521_v45, %v732_v58  ;;  %v830_v37 = vsel %vm829_vm6, %v2412_v8, %v822_v19 }
 0x1da   :  { %v842_v7 = vsel %vm829_vm6, %v822_v19, %v2404_v6  ;;  %v863_v20 = vmul.f32 %v847_v59, %v838_v33  ;;  %v864_v5 = vmul.f32 %v848_v27, %v834_v41  ;;  %v543_v54 = vadd.f32 %v527_v28, %v429_v44  ;;  %v707_v28 = vld [vmem:[#allocation2 + $0x1b8] sm:$0xff] }
 0x1db   :  { %v661_v3 = vpop.permute.xlu1 %660  ;;  %v904_v49 = vpop.permute.xlu0 %903  ;;  %v622_v8 = vmul.f32 %v606_v2, %v598_v24  ;;  %v625_v4 = vmul.f32 %v609_v11, %v586_v13  ;;  %v784_v12 = vadd.f32 %v2530_v21, %v735_v10  ;;  %v865_v6 = vmul.f32 %v849_v61, %v830_v37  ;;  %v1046_v13 = vld [vmem:[#allocation2 + $0x398] sm:$0xff]  ;;  %v1044_v61 = vld [vmem:[#allocation2 + $0x388] sm:$0xff] }
 0x1dc   :  { %v688_v45 = vsel %vm682_vm5, %v661_v3, %v2445_v17  ;;  %v692_v51 = vsel %vm682_vm5, %v2430_v14, %v661_v3  ;;  %v866_v19 = vmul.f32 %v850_v36, %v842_v7  ;;  %v932_v25 = vsel %vm927_vm7, %v904_v49, %v2447_v18 }
 0x1dd   :  { %468 = vrot.lane.b32.xlu1 %v2555_v62, %s2080_s16  ;;  %574 = vrot.lane.b32.xlu0 %v2552_v60, %s2081_s17  ;;  %v639_v1 = vadd.f32 %v623_v40, %v541_v35  ;;  %v640_v21 = vadd.f32 %v624_v39, %v542_v31  ;;  %v721_v53 = vmul.f32 %v705_v57, %v692_v51  ;;  %v947_v35 = vld [vmem:[#allocation2 + $0x310] sm:$0xff]  ;;  %v948_v31 = vld [vmem:[#allocation2 + $0x318] sm:$0xff] }
 0x1de   :  { %v722_v44 = vmul.f32 %v706_v42, %v688_v45  ;;  %v879_v58 = vadd.f32 %v863_v20, %v781_v26  ;;  %v880_v52 = vadd.f32 %v864_v5, %v782_v46  ;;  %v936_v3 = vsel %vm927_vm7, %v2432_v15, %v904_v49  ;;  %v1043_v26 = vld [vmem:[#allocation2 + $0x380] sm:$0xff]  ;;  %v852_v5 = vld [vmem:[#allocation2 + $0x2a8] sm:$0xff]  ;;  %v3380_v57 = vld [vmem:[#allocation15_spill] sm:$0xff] }
 0x1df   :  { %v677_v34 = vpop.permute.xlu1 %676  ;;  %v920_v38 = vpop.permute.xlu0 %919  ;;  %v962_v29 = vmul.f32 %v946_v48, %v932_v25  ;;  %v638_v49 = vadd.f32 %v622_v8, %v540_v63  ;;  %v641_v59 = vadd.f32 %v625_v4, %v543_v54  ;;  %v881_v27 = vadd.f32 %v865_v6, %v783_v22  ;;  %v3379_v63 = vld [vmem:[#allocation14_spill] sm:$0xff]  ;;  %v851_v20 = vld [vmem:[#allocation2 + $0x2a0] sm:$0xff] }
 0x1e0   :  { %v696_v56 = vsel %vm682_vm5, %v677_v34, %v2430_v14  ;;  %v684_v14 = vsel %vm682_vm5, %v2445_v17, %v677_v34  ;;  %v928_v10 = vsel %vm927_vm7, %v2447_v18, %v920_v38  ;;  %v940_v46 = vsel %vm927_vm7, %v920_v38, %v2432_v15  ;;  %v1045_v18 = vld [vmem:[#allocation2 + $0x390] sm:$0xff]  ;;  %v3381_v45 = vld [vmem:[#allocation13_spill] sm:$0xff] }
 0x1e1   :  { %484 = vrot.lane.b32.xlu1 %v2558_v0, %s2080_s16  ;;  %656 = vrot.lane.b32.xlu0 %v2513_v16, %s2082_s18  ;;  %v720_v55 = vmul.f32 %v704_v50, %v696_v56  ;;  %v882_v41 = vadd.f32 %v866_v19, %v784_v12  ;;  %v737_v17 = vadd.f32 %v721_v53, %v639_v1  ;;  %v853_v56 = vld [vmem:[#allocation2 + $0x2b0] sm:$0xff]  ;;  %v854_v1 = vld [vmem:[#allocation2 + $0x2b8] sm:$0xff] }
 0x1e2   :  { %v738_v33 = vadd.f32 %v722_v44, %v640_v21  ;;  %v961_v40 = vmul.f32 %v945_v32, %v936_v3  ;;  %v723_v2 = vmul.f32 %v707_v28, %v684_v14  ;;  %v963_v39 = vmul.f32 %v947_v35, %v928_v10  ;;  %v949_v28 = vld [vmem:[#allocation2 + $0x320] sm:$0xff]  ;;  %v950_v14 = vld [vmem:[#allocation2 + $0x328] sm:$0xff]  ;;  %v3384_v35 = vld [vmem:[#allocation16_spill] sm:$0xff] }
 0x1e3   :  { %v808_v47 = vpop.permute.xlu1 %807  ;;  %v1002_v43 = vpop.permute.xlu0 %1001  ;;  %v964_v15 = vmul.f32 %v948_v31, %v940_v46  ;;  %v978_v37 = vadd.f32 %v962_v29, %v880_v52  ;;  %v736_v7 = vadd.f32 %v720_v55, %v638_v49  ;;  %v3383_v29 = vld [vmem:[#allocation17_spill] sm:$0xff] }
 0x1e4   :  { %v1030_v22 = vsel %vm1025_vm8, %v1002_v43, %v2464_v23  ;;  %v1034_v36 = vsel %vm1025_vm8, %v3379_v63, %v1002_v43  ;;  %v835_v42 = vsel %vm829_vm6, %v808_v47, %v3380_v57  ;;  %v839_v51 = vsel %vm829_vm6, %v3381_v45, %v808_v47  ;;  %v3382_v47 = vld [vmem:[#allocation21_spill] sm:$0xff] }
 0x1e5   :  { %566 = vrot.lane.b32.xlu1 %v2555_v62, %s2081_s17  ;;  %672 = vrot.lane.b32.xlu0 %v2552_v60, %s2082_s18  ;;  %v739_v4 = vadd.f32 %v723_v2, %v641_v59  ;;  %v1059_v12 = vmul.f32 %v1043_v26, %v1034_v36  ;;  %v1060_v6 = vmul.f32 %v1044_v61, %v1030_v22  ;;  %v951_v59 = vld [vmem:[#allocation2 + $0x330] sm:$0xff]  ;;  %v3387_v22 = vld [vmem:[#allocation25_spill] sm:$0xff] }
 0x1e6   :  { %v979_v25 = vadd.f32 %v963_v39, %v881_v27  ;;  %v980_v50 = vadd.f32 %v964_v15, %v882_v41  ;;  %v785_v44 = vadd.f32 %v2533_v9, %v736_v7  ;;  %v786_v43 = vadd.f32 %v3382_v47, %v737_v17  ;;  %v952_v27 = vld [vmem:[#allocation2 + $0x338] sm:$0xff] }
 0x1e7   :  { %v824_v11 = vpop.permute.xlu1 %823  ;;  %v1018_v24 = vpop.permute.xlu0 %1017  ;;  %v868_v52 = vmul.f32 %v852_v5, %v835_v42  ;;  %v1076_v10 = vadd.f32 %v1060_v6, %v978_v37 }
 0x1e8   :  { %v1026_v34 = vsel %vm1025_vm8, %v2464_v23, %v1018_v24  ;;  %v1038_v38 = vsel %vm1025_vm8, %v1018_v24, %v3379_v63  ;;  %v977_v23 = vadd.f32 %v961_v40, %v879_v58  ;;  %v831_v21 = vsel %vm829_vm6, %v3380_v57, %v824_v11  ;;  %v3385_v40 = vld [vmem:[#allocation20_spill] sm:$0xff] }
 0x1e9   :  { %582 = vrot.lane.b32.xlu1 %v2558_v0, %s2081_s17  ;;  %v1061_v54 = vmul.f32 %v1045_v18, %v1026_v34  ;;  %v1062_v8 = vmul.f32 %v1046_v13, %v1038_v38  ;;  %803 = vrot.lane.b32.xlu0 %v2513_v16, %s2083_s19  ;;  %v843_v53 = vsel %vm829_vm6, %v824_v11, %v3381_v45  ;;  %v3386_v11 = vld [vmem:[#allocation22_spill] sm:$0xff]  ;;  %v1047_v34 = vld [vmem:[#allocation2 + $0x3a0] sm:$0xff]  ;;  %v3390_v57 = vld [vmem:[#allocation24_spill] sm:$0xff] }
 0x1ea   :  { %v867_v58 = vmul.f32 %v851_v20, %v839_v51  ;;  %v1075_v9 = vadd.f32 %v1059_v12, %v977_v23  ;;  %v869_v46 = vmul.f32 %v853_v56, %v831_v21  ;;  %v870_v49 = vmul.f32 %v854_v1, %v843_v53  ;;  %v1048_v38 = vld [vmem:[#allocation2 + $0x3a8] sm:$0xff]  ;;  %v3389_v20 = vld [vmem:[#allocation23_spill] sm:$0xff] }
 0x1eb   :  { %v906_v19 = vpop.permute.xlu1 %905  ;;  %v2787_v48 = vpop.permute.xlu0 %1093  ;;  %v1077_v32 = vadd.f32 %v1061_v54, %v979_v25  ;;  %v1078_v3 = vadd.f32 %v1062_v8, %v980_v50  ;;  %v787_v2 = vadd.f32 %v3385_v40, %v738_v33  ;;  %v788_v18 = vadd.f32 %v3386_v11, %v739_v4  ;;  %v3388_v33 = vld [vmem:[#allocation26_spill] sm:$0xff]  ;;  %v3391_v23 = vld [vmem:[#allocation19_spill] sm:$0xff] }
 0x1ec   :  { %v933_v55 = vsel %vm927_vm7, %v906_v19, %v3383_v29  ;;  %v937_v31 = vsel %vm927_vm7, %v3384_v35, %v906_v19  ;;  %v883_v39 = vadd.f32 %v867_v58, %v785_v44  ;;  %v884_v15 = vadd.f32 %v868_v52, %v786_v43  ;;  %v3392_v12 = vld [vmem:[#allocation18_spill] sm:$0xff]  ;;  %v1145_v19 = vld [vmem:[#allocation2 + $0x420] sm:$0xff]  ;;  %v1049_v58 = vld [vmem:[#allocation2 + $0x3b0] sm:$0xff] }
 0x1ed   :  { %664 = vrot.lane.b32.xlu1 %v2555_v62, %s2082_s18  ;;  %819 = vrot.lane.b32.xlu0 %v2552_v60, %s2083_s19  ;;  %v965_v26 = vmul.f32 %v949_v28, %v937_v31  ;;  %v966_v61 = vmul.f32 %v950_v14, %v933_v55  ;;  %v1175_v63 = vadd.f32 %v3387_v22, %v1077_v32  ;;  %v1146_v25 = vld [vmem:[#allocation2 + $0x428] sm:$0xff]  ;;  %v1050_v52 = vld [vmem:[#allocation2 + $0x3b8] sm:$0xff]  ;;  %v3393_v32 = vld [vmem:[#allocation5_spill] sm:$0xff] }
 0x1ee   :  { %v1176_v36 = vadd.f32 %v3388_v33, %v1078_v3  ;;  %v1173_v5 = vadd.f32 %v3389_v20, %v1075_v9  ;;  %v1174_v42 = vadd.f32 %v3390_v57, %v1076_v10  ;;  %v885_v45 = vadd.f32 %v869_v46, %v787_v2 }
 0x1ef   :  { %v922_v41 = vpop.permute.xlu1 %921  ;;  %v1110_v17 = vpop.permute.xlu0 %1109  ;;  %v886_v51 = vadd.f32 %v870_v49, %v788_v18  ;;  %v981_v1 = vadd.f32 %v965_v26, %v883_v39  ;;  %v982_v21 = vadd.f32 %v966_v61, %v884_v15  ;;  %v2839_v3 = vadd.f32 %v3393_v32, %v1175_v63  ;;  %v1147_v49 = vld [vmem:[#allocation2 + $0x430] sm:$0xff]  ;;  %v3394_v63 = vld [vmem:[#allocation6_spill] sm:$0xff] }
 0x1f0   :  { %v929_v13 = vsel %vm927_vm7, %v3383_v29, %v922_v41  ;;  %v941_v24 = vsel %vm927_vm7, %v922_v41, %v3384_v35  ;;  %v2842_v28 = vadd.f32 %v3393_v32, %v1176_v36 }
 0x1f1   :  { %680 = vrot.lane.b32.xlu1 %v2558_v0, %s2082_s18  ;;  %v967_v37 = vmul.f32 %v951_v59, %v929_v13  ;;  %v968_v7 = vmul.f32 %v952_v27, %v941_v24  ;;  %999 = vrot.lane.b32.xlu0 %v2513_v16, %s2085_s21  ;;  %v1148_v59 = vld [vmem:[#allocation2 + $0x438] sm:$0xff]  ;;  %v1802_v13 = vmul.f32 -1.442695, %v2839_v3  ;;  %v2861_v24 = vadd.f32 %v3393_v32, %v1173_v5 }
 0x1f2   :  { %v1803_v36 = vmul.f32 -1.442695, %v2842_v28 }
 0x1f3   :  { %v1004_v54 = vpop.permute.xlu1 %1003  ;;  %v1102_v8 = vpop.permute.xlu0 %1101  ;;  %v983_v47 = vadd.f32 %v967_v37, %v885_v45  ;;  %v984_v43 = vadd.f32 %v968_v7, %v886_v51  ;;  %1936 = vpow2.f32 %v1802_v13 }
 0x1f4   :  { %v1031_v4 = vsel %vm1025_vm8, %v1004_v54, %v3391_v23  ;;  %v1035_v6 = vsel %vm1025_vm8, %v3392_v12, %v1004_v54  ;;  %v1129_v50 = vsel %vm1123_vm1, %v1102_v8, %v1110_v17  ;;  %v1133_v56 = vsel %vm1123_vm1, %v2787_v48, %v1102_v8 }
 0x1f5   :  { %v1063_v53 = vmul.f32 %v1047_v34, %v1035_v6  ;;  %v1064_v44 = vmul.f32 %v1048_v38, %v1031_v4  ;;  %811 = vrot.lane.b32.xlu1 %v2555_v62, %s2083_s19  ;;  %1015 = vrot.lane.b32.xlu0 %v2552_v60, %s2085_s21  ;;  %v1161_v55 = vmul.f32 %v1145_v19, %v1133_v56  ;;  %v1800_v38 = vmul.f32 -1.442695, %v2861_v24 }
 0x1f6   :  { %v1162_v35 = vmul.f32 %v1146_v25, %v1129_v50  ;;  %1938 = vpow2.f32 %v1803_v36 }
 0x1f7   :  { %v1079_v14 = vadd.f32 %v1063_v53, %v981_v1  ;;  %v1080_v29 = vadd.f32 %v1064_v44, %v982_v21  ;;  %v1020_v31 = vpop.permute.xlu1 %1019  ;;  %v1118_v9 = vpop.permute.xlu0 %1117  ;;  %1940 = vpow2.f32 %v1800_v38 }
 0x1f8   :  { %v1027_v10 = vsel %vm1025_vm8, %v3391_v23, %v1020_v31  ;;  %v1039_v46 = vsel %vm1025_vm8, %v1020_v31, %v3392_v12  ;;  %v1125_v27 = vsel %vm1123_vm1, %v1110_v17, %v1118_v9  ;;  %v1137_v41 = vsel %vm1123_vm1, %v1118_v9, %v2787_v48 }
 0x1f9   :  { %v1177_v40 = vadd.f32 %v1161_v55, %v1079_v14  ;;  %v1178_v2 = vadd.f32 %v1162_v35, %v1080_v29  ;;  %v1065_v11 = vmul.f32 %v1049_v58, %v1027_v10  ;;  %v1066_v18 = vmul.f32 %v1050_v52, %v1039_v46  ;;  %827 = vrot.lane.b32.xlu1 %v2558_v0, %s2083_s19 }
 0x1fa   :  { %909 = vrot.lane.b32.xlu0 %v2555_v62, %s2084_s20  ;;  %v2864_v17 = vadd.f32 %v3393_v32, %v1174_v42  ;;  %v1163_v15 = vmul.f32 %v1147_v49, %v1125_v27  ;;  %v1164_v26 = vmul.f32 %v1148_v59, %v1137_v41 }
 0x1fb   :  { %v1081_v39 = vadd.f32 %v1065_v11, %v983_v47  ;;  %v1082_v48 = vadd.f32 %v1066_v18, %v984_v43  ;;  %v2866_v61 = vpop.permute.xlu1 %997  ;;  %v2868_v22 = vpop.permute.xlu0 %359  ;;  %v2871_v33 = vadd.f32 %v3394_v63, %v1177_v40  ;;  %v2875_v37 = vadd.f32 %v3394_v63, %v1178_v2 }
 0x1fc   :  { %v1801_v57 = vmul.f32 -1.442695, %v2864_v17 }
 0x1fd   :  { %v1179_v7 = vadd.f32 %v1163_v15, %v1081_v39  ;;  %v1180_v34 = vadd.f32 %v1164_v26, %v1082_v48  ;;  %1007 = vrot.lane.b32.xlu1 %v2555_v62, %s2085_s21  ;;  %v1804_v42 = vmul.f32 -1.442695, %v2871_v33  ;;  %v1805_v51 = vmul.f32 -1.442695, %v2875_v37  ;;  %v1937_v25 = vpop.eup %1936  ;;  %v414_v48 = vld [vmem:[#allocation2 + $0x40] sm:$0xff] }
 0x1fe   :  { %925 = vrot.lane.b32.xlu0 %v2558_v0, %s2084_s20  ;;  %1942 = vpow2.f32 %v1801_v57  ;;  %v1271_v53 = vadd.f32 1.0, %v1937_v25  ;;  %v512_v26 = vld [vmem:[#allocation2 + $0xc0] sm:$0xff]  ;;  %v416_v25 = vld [vmem:[#allocation2 + $0x50] sm:$0xff] }
 0x1ff   :  { %v2882_v20 = vpop.permute.xlu1 %1013  ;;  %v2884_v5 = vpop.permute.xlu0 %375  ;;  %v2889_v45 = vadd.f32 %v3394_v63, %v1179_v7  ;;  %v2893_v54 = vadd.f32 %v3394_v63, %v1180_v34  ;;  %1944 = vpow2.f32 %v1804_v42 }
 0x200   :  { %1946 = vpow2.f32 %v1805_v51  ;;  %v1939_v50 = vpop.eup %1938 }
 0x201   :  { %1023 = vrot.lane.b32.xlu1 %v2558_v0, %s2085_s21  ;;  %v1806_v4 = vmul.f32 -1.442695, %v2889_v45  ;;  %v1807_v12 = vmul.f32 -1.442695, %v2893_v54  ;;  %v1941_v21 = vpop.eup %1940  ;;  %v1272_v47 = vadd.f32 1.0, %v1939_v50 }
 0x202   :  { %1105 = vrot.lane.b32.xlu0 %v2555_v62, %s2078_s14  ;;  %v1269_v14 = vadd.f32 1.0, %v1941_v21 }
 0x203   :  { %v2899_v8 = vpop.permute.xlu1 %367  ;;  %v2901_v23 = vpop.permute.xlu0 %458  ;;  %1948 = vpow2.f32 %v1806_v4  ;;  %v610_v4 = vld [vmem:[#allocation2 + $0x140] sm:$0xff] }
 0x204   :  { %1950 = vpow2.f32 %v1807_v12  ;;  %v396_v51 = vsel %vm389_vm3, %v2899_v8, %v2884_v5  ;;  %v757_v12 = vld [vmem:[#allocation2 + $0x240] sm:$0xff]  ;;  %v400_v50 = vsel %vm389_vm3, %v2868_v22, %v2899_v8 }
 0x205   :  { %1113 = vrot.lane.b32.xlu1 %v2552_v60, %s2078_s14  ;;  %1952 = vrcp.f32 %v1271_v53  ;;  %v513_v53 = vld [vmem:[#allocation2 + $0xc8] sm:$0xff] }
 0x206   :  { %1121 = vrot.lane.b32.xlu0 %v2558_v0, %s2078_s14  ;;  %1954 = vrcp.f32 %v1272_v47 }
 0x207   :  { %v2909_v6 = vpop.permute.xlu1 %383  ;;  %v2911_v19 = vpop.permute.xlu0 %474  ;;  %1956 = vrcp.f32 %v1269_v14 }
 0x208   :  { %v1943_v44 = vpop.eup %1942  ;;  %v404_v15 = vsel %vm389_vm3, %v2909_v6, %v2868_v22 }
 0x209   :  { %v1945_v43 = vpop.eup %1944  ;;  %v1270_v29 = vadd.f32 1.0, %v1943_v44  ;;  %v430_v21 = vmul.f32 %v414_v48, %v404_v15  ;;  %v514_v48 = vld [vmem:[#allocation2 + $0xd0] sm:$0xff] }
 0x20a   :  { %v1947_v58 = vpop.eup %1946  ;;  %v1273_v55 = vadd.f32 1.0, %v1945_v43  ;;  %v708_v43 = vld [vmem:[#allocation2 + $0x1c0] sm:$0xff] }
 0x20b   :  { %v2913_v56 = vpop.permute.xlu1 %466  ;;  %v2915_v1 = vpop.permute.xlu0 %556  ;;  %v1274_v31 = vadd.f32 1.0, %v1947_v58  ;;  %1958 = vrcp.f32 %v1270_v29 }
 0x20c   :  { %1960 = vrcp.f32 %v1273_v55  ;;  %v497_v44 = vsel %vm486_vm2, %v2901_v23, %v2913_v56  ;;  %v611_v55 = vld [vmem:[#allocation2 + $0x148] sm:$0xff] }
 0x20d   :  { %v1949_v35 = vpop.eup %1948  ;;  %1962 = vrcp.f32 %v1274_v31 }
 0x20e   :  { %v1951_v9 = vpop.eup %1950  ;;  %v1275_v49 = vadd.f32 1.0, %v1949_v35 }
 0x20f   :  { %v2917_v52 = vpop.permute.xlu1 %482  ;;  %v2919_v32 = vpop.permute.xlu0 %572  ;;  %v1276_v59 = vadd.f32 1.0, %v1951_v9 }
 0x210   :  { %1964 = vrcp.f32 %v1275_v49  ;;  %v1953_v40 = vpop.eup %1952  ;;  %v501_v63 = vsel %vm486_vm2, %v2917_v52, %v2901_v23 }
 0x211   :  { %1966 = vrcp.f32 %v1276_v59  ;;  %v1955_v2 = vpop.eup %1954  ;;  %v2940_v36 = vmul.f32 %v1953_v40, %v2839_v3  ;;  %v528_v47 = vmul.f32 %v512_v26, %v501_v63  ;;  %v432_v40 = vmul.f32 %v416_v25, %v396_v51  ;;  %v709_v26 = vld [vmem:[#allocation2 + $0x1c8] sm:$0xff] }
 0x212   :  { %v1957_v13 = vpop.eup %1956  ;;  %v2943_v7 = vmul.f32 %v1955_v2, %v2842_v28  ;;  %v415_v28 = vld [vmem:[#allocation2 + $0x48] sm:$0xff]  ;;  %v529_v2 = vmul.f32 %v513_v53, %v497_v44  ;;  %v392_v63 = vsel %vm389_vm3, %v2884_v5, %v2909_v6  ;;  %v613_v44 = vld [vmem:[#allocation2 + $0x158] sm:$0xff] }
 0x213   :  { %v2921_v10 = vpop.permute.xlu1 %564  ;;  %v655_v46 = vpop.permute.xlu0 %654  ;;  %v2971_v29 = vmul.f32 %v1957_v13, %v2861_v24  ;;  %v3395_v13 = vld [vmem:[#allocation9_spill] sm:$0xff]  ;;  %v544_v15 = vadd.f32 %v528_v47, %v430_v21 }
 0x214   :  { %v1475_v14 = vadd.f32 %v2943_v7, %v2940_v36  ;;  %v595_v23 = vsel %vm584_vm4, %v2915_v1, %v2921_v10 }
 0x215   :  { %v1959_v39 = vpop.eup %1958 }
 0x216   :  { %v1961_v34 = vpop.eup %1960  ;;  %v2974_v22 = vmul.f32 %v1959_v39, %v2864_v17  ;;  %v431_v17 = vmul.f32 %v415_v28, %v400_v50  ;;  %v773_v39 = vmul.f32 %v757_v12, %v3395_v13  ;;  %v591_v50 = vsel %vm584_vm4, %v2921_v10, %v2919_v32 }
 0x217   :  { %v2923_v27 = vpop.permute.xlu1 %580  ;;  %v2925_v41 = vpop.permute.xlu0 %670  ;;  %v2983_v49 = vmul.f32 %v1961_v34, %v2871_v33  ;;  %v515_v34 = vld [vmem:[#allocation2 + $0xd8] sm:$0xff] }
 0x218   :  { %v1963_v42 = vpop.eup %1962  ;;  %v599_v3 = vsel %vm584_vm4, %v2923_v27, %v2915_v1  ;;  %v493_v1 = vsel %vm486_vm2, %v2913_v56, %v2911_v19  ;;  %v627_v56 = vmul.f32 %v611_v55, %v595_v23  ;;  %v1333_v51 = vadd.f32 %v2974_v22, %v2971_v29 }
 0x219   :  { %v626_v35 = vmul.f32 %v610_v4, %v599_v3  ;;  %v2986_v24 = vmul.f32 %v1963_v42, %v2875_v37  ;;  %v489_v42 = vsel %vm486_vm2, %v2911_v19, %v2917_v52  ;;  %v417_v4 = vld [vmem:[#allocation2 + $0x58] sm:$0xff]  ;;  %v530_v25 = vmul.f32 %v514_v48, %v493_v1  ;;  %v612_v52 = vld [vmem:[#allocation2 + $0x150] sm:$0xff] }
 0x21a   :  { %v1965_v8 = vpop.eup %1964  ;;  %v545_v19 = vadd.f32 %v529_v2, %v431_v17  ;;  %v531_v53 = vmul.f32 %v515_v34, %v489_v42  ;;  %v628_v23 = vmul.f32 %v612_v52, %v591_v50  ;;  %v857_v52 = vld [vmem:[#allocation2 + $0x2d0] sm:$0xff]  ;;  %v858_v50 = vld [vmem:[#allocation2 + $0x2d8] sm:$0xff] }
 0x21b   :  { %v2927_v11 = vpop.permute.xlu1 %662  ;;  %v2929_v18 = vpop.permute.xlu0 %801  ;;  %v642_v3 = vadd.f32 %v626_v35, %v544_v15  ;;  %v1336_v28 = vadd.f32 %v2986_v24, %v2983_v49  ;;  %v3011_v5 = vmul.f32 %v1965_v8, %v2889_v45  ;;  %v587_v45 = vsel %vm584_vm4, %v2919_v32, %v2923_v27  ;;  %v711_v8 = vld [vmem:[#allocation2 + $0x1d8] sm:$0xff]  ;;  %v855_v32 = vld [vmem:[#allocation2 + $0x2c0] sm:$0xff]  ;;  %v856_v27 = vld [vmem:[#allocation2 + $0x2c8] sm:$0xff] }
 0x21c   :  { %v1967_v59 = vpop.eup %1966  ;;  %v693_v33 = vsel %vm682_vm5, %v655_v46, %v2927_v11  ;;  %v689_v10 = vsel %vm682_vm5, %v2927_v11, %v2925_v41  ;;  %v546_v13 = vadd.f32 %v530_v25, %v432_v40  ;;  %v629_v48 = vmul.f32 %v613_v44, %v587_v45  ;;  %v3397_v44 = vld [vmem:[#allocation10_spill] sm:$0xff] }
 0x21d   :  { %v3014_v6 = vmul.f32 %v1967_v59, %v2893_v54  ;;  %v725_v21 = vmul.f32 %v709_v26, %v693_v33  ;;  %v433_v54 = vmul.f32 %v417_v4, %v392_v63  ;;  %v759_v63 = vld [vmem:[#allocation2 + $0x250] sm:$0xff] }
 0x21e   :  { %v775_v45 = vmul.f32 %v759_v63, %v3397_v44  ;;  %v1152_v44 = vld [vmem:[#allocation2 + $0x458] sm:$0xff] }
 0x21f   :  { %v2945_v38 = vpop.permute.xlu1 %678  ;;  %v2947_v57 = vpop.permute.xlu0 %817  ;;  %v1478_v11 = vadd.f32 %v3014_v6, %v3011_v5  ;;  %v547_v15 = vadd.f32 %v531_v53, %v433_v54 }
 0x220   :  { %v697_v58 = vsel %vm682_vm5, %v2945_v38, %v655_v46  ;;  %v685_v55 = vsel %vm682_vm5, %v2925_v41, %v2945_v38  ;;  %v3396_v38 = vld [vmem:[#allocation11_spill] sm:$0xff] }
 0x221   :  { %v724_v37 = vmul.f32 %v708_v43, %v697_v58  ;;  %v758_v43 = vld [vmem:[#allocation2 + $0x248] sm:$0xff]  ;;  %v643_v58 = vadd.f32 %v627_v56, %v545_v19  ;;  %v727_v33 = vmul.f32 %v711_v8, %v685_v55  ;;  %v953_v56 = vld [vmem:[#allocation2 + $0x340] sm:$0xff]  ;;  %v645_v19 = vadd.f32 %v629_v48, %v547_v15 }
 0x222   :  { %v774_v1 = vmul.f32 %v758_v43, %v3396_v38  ;;  %v1150_v48 = vld [vmem:[#allocation2 + $0x448] sm:$0xff] }
 0x223   :  { %v810_v31 = vpop.permute.xlu1 %809  ;;  %v2980_v9 = vpop.permute.xlu0 %899  ;;  %v740_v47 = vadd.f32 %v724_v37, %v642_v3  ;;  %v741_v41 = vadd.f32 %v725_v21, %v643_v58  ;;  %v644_v3 = vadd.f32 %v628_v23, %v546_v13  ;;  %v1051_v23 = vld [vmem:[#allocation2 + $0x3c0] sm:$0xff] }
 0x224   :  { %v836_v35 = vsel %vm829_vm6, %v810_v31, %v2947_v57  ;;  %v840_v59 = vsel %vm829_vm6, %v2929_v18, %v810_v31  ;;  %v760_v31 = vld [vmem:[#allocation2 + $0x258] sm:$0xff]  ;;  %v1149_v13 = vld [vmem:[#allocation2 + $0x440] sm:$0xff] }
 0x225   :  { %1476 = vadd.xlane.f32.xlu0 %v1475_v14  ;;  %v710_v14 = vld [vmem:[#allocation2 + $0x1d0] sm:$0xff]  ;;  %v789_v37 = vadd.f32 %v773_v39, %v740_v47  ;;  %v871_v34 = vmul.f32 %v855_v32, %v840_v59  ;;  %v872_v42 = vmul.f32 %v856_v27, %v836_v35  ;;  %v790_v39 = vadd.f32 %v774_v1, %v741_v41  ;;  %v3398_v47 = vld [vmem:[#allocation12_spill] sm:$0xff]  ;;  %v1052_v32 = vld [vmem:[#allocation2 + $0x3c8] sm:$0xff] }
 0x226   :  { %v726_v26 = vmul.f32 %v710_v14, %v689_v10  ;;  %v776_v43 = vmul.f32 %v760_v31, %v3398_v47  ;;  %v743_v10 = vadd.f32 %v727_v33, %v645_v19  ;;  %v955_v59 = vld [vmem:[#allocation2 + $0x350] sm:$0xff] }
 0x227   :  { %v826_v46 = vpop.permute.xlu1 %825  ;;  %v3006_v12 = vpop.permute.xlu0 %915  ;;  %v887_v8 = vadd.f32 %v871_v34, %v789_v37  ;;  %v888_v55 = vadd.f32 %v872_v42, %v790_v39  ;;  %v1053_v19 = vld [vmem:[#allocation2 + $0x3d0] sm:$0xff]  ;;  %v1054_v39 = vld [vmem:[#allocation2 + $0x3d8] sm:$0xff] }
 0x228   :  { %v832_v21 = vsel %vm829_vm6, %v2947_v57, %v826_v46  ;;  %v844_v53 = vsel %vm829_vm6, %v826_v46, %v2929_v18  ;;  %v742_v14 = vadd.f32 %v726_v26, %v644_v3  ;;  %v956_v57 = vld [vmem:[#allocation2 + $0x358] sm:$0xff]  ;;  %v792_v63 = vadd.f32 %v776_v43, %v743_v10 }
 0x229   :  { %1337 = vadd.xlane.f32.xlu0 %v1336_v28  ;;  %1334 = vadd.xlane.f32.xlu1 %v1333_v51  ;;  %v954_v51 = vld [vmem:[#allocation2 + $0x348] sm:$0xff]  ;;  %v873_v27 = vmul.f32 %v857_v52, %v832_v21  ;;  %v874_v35 = vmul.f32 %v858_v50, %v844_v53  ;;  %v1151_v53 = vld [vmem:[#allocation2 + $0x450] sm:$0xff] }
 0x22a   :  { %v791_v37 = vadd.f32 %v775_v45, %v742_v14 }
 0x22b   :  { %v908_v17 = vpop.permute.xlu1 %907  ;;  %v3038_v2 = vpop.permute.xlu0 %1095 }
 0x22c   :  { %v934_v4 = vsel %vm927_vm7, %v908_v17, %v3006_v12  ;;  %v938_v40 = vsel %vm927_vm7, %v2980_v9, %v908_v17  ;;  %v889_v3 = vadd.f32 %v873_v27, %v791_v37 }
 0x22d   :  { %1479 = vadd.xlane.f32.xlu1 %v1478_v11  ;;  %v969_v54 = vmul.f32 %v953_v56, %v938_v40  ;;  %v970_v58 = vmul.f32 %v954_v51, %v934_v4 }
 0x22f   :  { %v924_v28 = vpop.permute.xlu1 %923  ;;  %v1112_v25 = vpop.permute.xlu0 %1111  ;;  %v986_v15 = vadd.f32 %v970_v58, %v888_v55 }
 0x230   :  { %v930_v18 = vsel %vm927_vm7, %v3006_v12, %v924_v28  ;;  %v942_v46 = vsel %vm927_vm7, %v924_v28, %v2980_v9  ;;  %v985_v9 = vadd.f32 %v969_v54, %v887_v8  ;;  %v890_v28 = vadd.f32 %v874_v35, %v792_v63 }
 0x231   :  { %v971_v34 = vmul.f32 %v955_v59, %v930_v18  ;;  %v972_v42 = vmul.f32 %v956_v57, %v942_v46 }
 0x233   :  { %v1104_v17 = vpop.permute.xlu1 %1103  ;;  %v1006_v11 = vpop.permute.xlu0 %1005  ;;  %v987_v43 = vadd.f32 %v971_v34, %v889_v3  ;;  %v988_v54 = vadd.f32 %v972_v42, %v890_v28 }
 0x234   :  { %v1130_v41 = vsel %vm1123_vm1, %v1104_v17, %v1112_v25  ;;  %v1134_v38 = vsel %vm1123_vm1, %v3038_v2, %v1104_v17  ;;  %v1032_v1 = vsel %vm1025_vm8, %v1006_v11, %v2882_v20  ;;  %v1036_v12 = vsel %vm1025_vm8, %v2866_v61, %v1006_v11 }
 0x235   :  { %v1067_v26 = vmul.f32 %v1051_v23, %v1036_v12  ;;  %v1068_v33 = vmul.f32 %v1052_v32, %v1032_v1  ;;  %v1165_v31 = vmul.f32 %v1149_v13, %v1134_v38  ;;  %v1166_v56 = vmul.f32 %v1150_v48, %v1130_v41  ;;  %v3399_v23 = vld [vmem:[#allocation8_spill] sm:$0xff] }
 0x237   :  { %v1083_v51 = vadd.f32 %v1067_v26, %v985_v9  ;;  %v1084_v4 = vadd.f32 %v1068_v33, %v986_v15  ;;  %v1120_v40 = vpop.permute.xlu1 %1119  ;;  %v1022_v52 = vpop.permute.xlu0 %1021 }
 0x238   :  { %v1126_v45 = vsel %vm1123_vm1, %v1112_v25, %v1120_v40  ;;  %v1138_v47 = vsel %vm1123_vm1, %v1120_v40, %v3038_v2  ;;  %v1028_v58 = vsel %vm1025_vm8, %v2882_v20, %v1022_v52  ;;  %v1040_v14 = vsel %vm1025_vm8, %v1022_v52, %v2866_v61 }
 0x239   :  { %v1181_v50 = vadd.f32 %v1165_v31, %v1083_v51  ;;  %v1182_v21 = vadd.f32 %v1166_v56, %v1084_v4  ;;  %v1069_v10 = vmul.f32 %v1053_v19, %v1028_v58  ;;  %v1070_v8 = vmul.f32 %v1054_v39, %v1040_v14  ;;  %v516_v14 = vld [vmem:[#allocation2 + $0xe0] sm:$0xff] }
 0x23a   :  { %v1167_v27 = vmul.f32 %v1151_v53, %v1126_v45  ;;  %v1168_v2 = vmul.f32 %v1152_v44, %v1138_v47 }
 0x23b   :  { %v3085_v55 = vpop.permute.xlu1 %901  ;;  %v1213_v25 = vadd.f32 %v3399_v23, %v1181_v50  ;;  %v1214_v32 = vadd.f32 %v3399_v23, %v1182_v21  ;;  %v3089_v35 = vpop.permute.xlu0 %361  ;;  %v1085_v59 = vadd.f32 %v1069_v10, %v987_v43  ;;  %v1086_v57 = vadd.f32 %v1070_v8, %v988_v54 }
 0x23d   :  { %v1808_v18 = vmul.f32 -1.442695, %v1213_v25  ;;  %v1809_v20 = vmul.f32 -1.442695, %v1214_v32  ;;  %v1183_v46 = vadd.f32 %v1167_v27, %v1085_v59  ;;  %v1184_v17 = vadd.f32 %v1168_v2, %v1086_v57  ;;  %v614_v27 = vld [vmem:[#allocation2 + $0x160] sm:$0xff]  ;;  %v517_v57 = vld [vmem:[#allocation2 + $0xe8] sm:$0xff] }
 0x23f   :  { %v3091_v11 = vpop.permute.xlu1 %917  ;;  %1968 = vpow2.f32 %v1808_v18  ;;  %v3093_v61 = vpop.permute.xlu0 %377  ;;  %v1215_v13 = vadd.f32 %v3399_v23, %v1183_v46  ;;  %v1216_v48 = vadd.f32 %v3399_v23, %v1184_v17 }
 0x240   :  { %1970 = vpow2.f32 %v1809_v20 }
 0x241   :  { %v1810_v38 = vmul.f32 -1.442695, %v1215_v13  ;;  %v1811_v1 = vmul.f32 -1.442695, %v1216_v48 }
 0x243   :  { %v3097_v41 = vpop.permute.xlu1 %1097  ;;  %v461_v12 = vpop.permute.xlu0 %460  ;;  %1972 = vpow2.f32 %v1810_v38 }
 0x244   :  { %1974 = vpow2.f32 %v1811_v1  ;;  %v518_v1 = vld [vmem:[#allocation2 + $0xf0] sm:$0xff] }
 0x247   :  { %v370_v9 = vpop.permute.xlu1 %369  ;;  %v477_v15 = vpop.permute.xlu0 %476 }
 0x249   :  { %v1969_v26 = vpop.eup %1968 }
 0x24a   :  { %v1971_v33 = vpop.eup %1970  ;;  %v1277_v37 = vadd.f32 1.0, %v1969_v26 }
 0x24b   :  { %v3099_v63 = vpop.permute.xlu1 %385  ;;  %v1278_v34 = vadd.f32 1.0, %v1971_v33  ;;  %v559_v42 = vpop.permute.xlu0 %558 }
 0x24c   :  { %1976 = vrcp.f32 %v1277_v37  ;;  %v712_v37 = vld [vmem:[#allocation2 + $0x1e0] sm:$0xff] }
 0x24d   :  { %1978 = vrcp.f32 %v1278_v34  ;;  %v1973_v31 = vpop.eup %1972 }
 0x24e   :  { %v1975_v51 = vpop.eup %1974  ;;  %v1279_v40 = vadd.f32 1.0, %v1973_v31  ;;  %v615_v31 = vld [vmem:[#allocation2 + $0x168] sm:$0xff] }
 0x24f   :  { %v469_v56 = vpop.permute.xlu1 %468  ;;  %v3101_v4 = vpop.permute.xlu0 %574  ;;  %v1280_v3 = vadd.f32 1.0, %v1975_v51 }
 0x250   :  { %1980 = vrcp.f32 %v1279_v40  ;;  %v498_v18 = vsel %vm486_vm2, %v461_v12, %v469_v56  ;;  %v494_v26 = vsel %vm486_vm2, %v469_v56, %v477_v15  ;;  %v616_v56 = vld [vmem:[#allocation2 + $0x170] sm:$0xff] }
 0x251   :  { %1982 = vrcp.f32 %v1280_v3  ;;  %v533_v34 = vmul.f32 %v517_v57, %v498_v18  ;;  %v420_v3 = vld [vmem:[#allocation2 + $0x70] sm:$0xff] }
 0x253   :  { %v485_v28 = vpop.permute.xlu1 %484  ;;  %v657_v19 = vpop.permute.xlu0 %656 }
 0x254   :  { %v502_v10 = vsel %vm486_vm2, %v485_v28, %v461_v12  ;;  %v397_v12 = vsel %vm389_vm3, %v370_v9, %v3093_v61 }
 0x255   :  { %v532_v20 = vmul.f32 %v516_v14, %v502_v10  ;;  %v534_v14 = vmul.f32 %v518_v1, %v494_v26  ;;  %v436_v57 = vmul.f32 %v420_v3, %v397_v12  ;;  %v859_v12 = vld [vmem:[#allocation2 + $0x2e0] sm:$0xff]  ;;  %v763_v3 = vld [vmem:[#allocation2 + $0x270] sm:$0xff] }
 0x256   :  { %v1977_v39 = vpop.eup %1976 }
 0x257   :  { %v1979_v52 = vpop.eup %1978  ;;  %v567_v50 = vpop.permute.xlu1 %566  ;;  %v3103_v21 = vmul.f32 %v1977_v39, %v1213_v25  ;;  %v418_v25 = vld [vmem:[#allocation2 + $0x60] sm:$0xff]  ;;  %v490_v39 = vsel %vm486_vm2, %v477_v15, %v485_v28  ;;  %v393_v15 = vsel %vm389_vm3, %v3093_v61, %v3099_v63  ;;  %v715_v61 = vld [vmem:[#allocation2 + $0x1f8] sm:$0xff] }
 0x258   :  { %v3105_v53 = vpop.permute.xlu0 %672  ;;  %v3107_v44 = vmul.f32 %v1979_v52, %v1214_v32  ;;  %v405_v32 = vsel %vm389_vm3, %v3099_v63, %v3089_v35  ;;  %v596_v51 = vsel %vm584_vm4, %v559_v42, %v567_v50 }
 0x259   :  { %v434_v38 = vmul.f32 %v418_v25, %v405_v32  ;;  %v421_v32 = vld [vmem:[#allocation2 + $0x78] sm:$0xff]  ;;  %v631_v28 = vmul.f32 %v615_v31, %v596_v51 }
 0x25a   :  { %v1339_v45 = vadd.f32 %v3107_v44, %v3103_v21  ;;  %v1981_v43 = vpop.eup %1980 }
 0x25b   :  { %v583_v47 = vpop.permute.xlu1 %582  ;;  %v1983_v58 = vpop.eup %1982  ;;  %v3115_v8 = vmul.f32 %v1981_v43, %v1215_v13  ;;  %v419_v13 = vld [vmem:[#allocation2 + $0x68] sm:$0xff]  ;;  %v548_v52 = vadd.f32 %v532_v20, %v434_v38 }
 0x25c   :  { %1340 = vadd.xlane.f32.xlu0 %v1339_v45  ;;  %v3111_v54 = vpop.permute.xlu0 %803  ;;  %v3117_v23 = vmul.f32 %v1983_v58, %v1216_v48  ;;  %v600_v2 = vsel %vm584_vm4, %v583_v47, %v559_v42  ;;  %v401_v48 = vsel %vm389_vm3, %v3089_v35, %v370_v9  ;;  %v519_v35 = vld [vmem:[#allocation2 + $0xf8] sm:$0xff]  ;;  %v592_v45 = vsel %vm584_vm4, %v567_v50, %v3101_v4  ;;  %v713_v42 = vld [vmem:[#allocation2 + $0x1e8] sm:$0xff] }
 0x25d   :  { %v630_v33 = vmul.f32 %v614_v27, %v600_v2  ;;  %v435_v58 = vmul.f32 %v419_v13, %v401_v48  ;;  %v617_v50 = vld [vmem:[#allocation2 + $0x178] sm:$0xff]  ;;  %v588_v27 = vsel %vm584_vm4, %v3101_v4, %v583_v47  ;;  %v535_v18 = vmul.f32 %v519_v35, %v490_v39  ;;  %v761_v13 = vld [vmem:[#allocation2 + $0x260] sm:$0xff] }
 0x25e   :  { %v1481_v17 = vadd.f32 %v3117_v23, %v3115_v8  ;;  %v632_v20 = vmul.f32 %v616_v56, %v592_v45  ;;  %v437_v47 = vmul.f32 %v421_v32, %v393_v15  ;;  %v861_v15 = vld [vmem:[#allocation2 + $0x2f0] sm:$0xff] }
 0x25f   :  { %v665_v59 = vpop.permute.xlu1 %664  ;;  %v646_v2 = vadd.f32 %v630_v33, %v548_v52  ;;  %v549_v38 = vadd.f32 %v533_v34, %v435_v58  ;;  %v550_v33 = vadd.f32 %v534_v14, %v436_v57  ;;  %v777_v34 = vmul.f32 %v761_v13, %v2513_v16 }
 0x260   :  { %v3127_v46 = vpop.permute.xlu0 %819  ;;  %1482 = vadd.xlane.f32.xlu1 %v1481_v17  ;;  %v694_v10 = vsel %vm682_vm5, %v657_v19, %v665_v59  ;;  %v714_v17 = vld [vmem:[#allocation2 + $0x1f0] sm:$0xff]  ;;  %v551_v35 = vadd.f32 %v535_v18, %v437_v47  ;;  %v779_v16 = vmul.f32 %v763_v3, %v2552_v60  ;;  %v862_v18 = vld [vmem:[#allocation2 + $0x2f8] sm:$0xff]  ;;  %v1056_v47 = vld [vmem:[#allocation2 + $0x3e8] sm:$0xff] }
 0x261   :  { %v729_v1 = vmul.f32 %v713_v42, %v694_v10  ;;  %v647_v31 = vadd.f32 %v631_v28, %v549_v38  ;;  %v648_v39 = vadd.f32 %v632_v20, %v550_v33  ;;  %v957_v10 = vld [vmem:[#allocation2 + $0x360] sm:$0xff]  ;;  %v1057_v3 = vld [vmem:[#allocation2 + $0x3f0] sm:$0xff] }
 0x263   :  { %v681_v40 = vpop.permute.xlu1 %680  ;;  %v745_v45 = vadd.f32 %v729_v1, %v647_v31 }
 0x264   :  { %v698_v9 = vsel %vm682_vm5, %v681_v40, %v657_v19  ;;  %v3148_v43 = vpop.permute.xlu0 %999  ;;  %v690_v19 = vsel %vm682_vm5, %v665_v59, %v3105_v53  ;;  %v686_v63 = vsel %vm682_vm5, %v3105_v53, %v681_v40  ;;  %v762_v53 = vld [vmem:[#allocation2 + $0x268] sm:$0xff]  ;;  %v764_v40 = vld [vmem:[#allocation2 + $0x278] sm:$0xff] }
 0x265   :  { %v728_v25 = vmul.f32 %v712_v37, %v698_v9  ;;  %v633_v37 = vmul.f32 %v617_v50, %v588_v27  ;;  %v730_v51 = vmul.f32 %v714_v17, %v690_v19  ;;  %v731_v52 = vmul.f32 %v715_v61, %v686_v63  ;;  %v860_v9 = vld [vmem:[#allocation2 + $0x2e8] sm:$0xff]  ;;  %v959_v63 = vld [vmem:[#allocation2 + $0x370] sm:$0xff] }
 0x266   :  { %v780_v57 = vmul.f32 %v764_v40, %v2558_v0  ;;  %v958_v19 = vld [vmem:[#allocation2 + $0x368] sm:$0xff]  ;;  %v1058_v40 = vld [vmem:[#allocation2 + $0x3f8] sm:$0xff] }
 0x267   :  { %v812_v48 = vpop.permute.xlu1 %811  ;;  %v744_v26 = vadd.f32 %v728_v25, %v646_v2  ;;  %v649_v32 = vadd.f32 %v633_v37, %v551_v35  ;;  %v746_v27 = vadd.f32 %v730_v51, %v648_v39  ;;  %v778_v2 = vmul.f32 %v762_v53, %v2555_v62  ;;  %v960_v37 = vld [vmem:[#allocation2 + $0x378] sm:$0xff] }
 0x268   :  { %v3165_v4 = vpop.permute.xlu0 %1015  ;;  %v841_v59 = vsel %vm829_vm6, %v3111_v54, %v812_v48  ;;  %v837_v14 = vsel %vm829_vm6, %v812_v48, %v3127_v46  ;;  %v1055_v48 = vld [vmem:[#allocation2 + $0x3e0] sm:$0xff] }
 0x269   :  { %v793_v58 = vadd.f32 %v777_v34, %v744_v26  ;;  %v875_v42 = vmul.f32 %v859_v12, %v841_v59  ;;  %v747_v60 = vadd.f32 %v731_v52, %v649_v32  ;;  %v876_v17 = vmul.f32 %v860_v9, %v837_v14 }
 0x26a   :  { %v794_v1 = vadd.f32 %v778_v2, %v745_v45  ;;  %v795_v31 = vadd.f32 %v779_v16, %v746_v27  ;;  %v1153_v45 = vld [vmem:[#allocation2 + $0x460] sm:$0xff]  ;;  %v1154_v27 = vld [vmem:[#allocation2 + $0x468] sm:$0xff] }
 0x26b   :  { %v828_v56 = vpop.permute.xlu1 %827  ;;  %v891_v61 = vadd.f32 %v875_v42, %v793_v58  ;;  %v796_v39 = vadd.f32 %v780_v57, %v747_v60 }
 0x26c   :  { %v910_v25 = vpop.permute.xlu0 %909  ;;  %v833_v28 = vsel %vm829_vm6, %v3127_v46, %v828_v56  ;;  %v845_v20 = vsel %vm829_vm6, %v828_v56, %v3111_v54  ;;  %v892_v35 = vadd.f32 %v876_v17, %v794_v1 }
 0x26d   :  { %v939_v50 = vsel %vm927_vm7, %v3085_v55, %v910_v25  ;;  %v935_v46 = vsel %vm927_vm7, %v910_v25, %v3091_v11  ;;  %v877_v62 = vmul.f32 %v861_v15, %v833_v28  ;;  %v878_v54 = vmul.f32 %v862_v18, %v845_v20  ;;  %v1156_v18 = vld [vmem:[#allocation2 + $0x478] sm:$0xff] }
 0x26e   :  { %v973_v13 = vmul.f32 %v957_v10, %v939_v50  ;;  %v974_v51 = vmul.f32 %v958_v19, %v935_v46 }
 0x26f   :  { %v1008_v38 = vpop.permute.xlu1 %1007  ;;  %v893_v42 = vadd.f32 %v877_v62, %v795_v31  ;;  %v894_v10 = vadd.f32 %v878_v54, %v796_v39 }
 0x270   :  { %v1037_v0 = vsel %vm1025_vm8, %v3148_v43, %v1008_v38  ;;  %v926_v26 = vpop.permute.xlu0 %925  ;;  %v1033_v33 = vsel %vm1025_vm8, %v1008_v38, %v3165_v4  ;;  %v989_v52 = vadd.f32 %v973_v13, %v891_v61  ;;  %v990_v16 = vadd.f32 %v974_v51, %v892_v35  ;;  %v3400_v61 = vld [vmem:[#allocation7_spill] sm:$0xff] }
 0x271   :  { %v931_v12 = vsel %vm927_vm7, %v3091_v11, %v926_v26  ;;  %v943_v59 = vsel %vm927_vm7, %v926_v26, %v3085_v55  ;;  %v1071_v34 = vmul.f32 %v1055_v48, %v1037_v0  ;;  %v1072_v9 = vmul.f32 %v1056_v47, %v1033_v33 }
 0x272   :  { %v975_v53 = vmul.f32 %v959_v63, %v931_v12  ;;  %v976_v58 = vmul.f32 %v960_v37, %v943_v59 }
 0x273   :  { %v1024_v56 = vpop.permute.xlu1 %1023  ;;  %v1087_v15 = vadd.f32 %v1071_v34, %v989_v52  ;;  %v1088_v20 = vadd.f32 %v1072_v9, %v990_v16 }
 0x274   :  { %v1029_v11 = vsel %vm1025_vm8, %v3165_v4, %v1024_v56  ;;  %v1041_v55 = vsel %vm1025_vm8, %v1024_v56, %v3148_v43  ;;  %v1106_v14 = vpop.permute.xlu0 %1105  ;;  %v991_v2 = vadd.f32 %v975_v53, %v893_v42  ;;  %v1155_v4 = vld [vmem:[#allocation2 + $0x470] sm:$0xff]  ;;  %v992_v60 = vadd.f32 %v976_v58, %v894_v10 }
 0x275   :  { %v1073_v25 = vmul.f32 %v1057_v3, %v1029_v11  ;;  %v1135_v32 = vsel %vm1123_vm1, %v3097_v41, %v1106_v14  ;;  %v1074_v28 = vmul.f32 %v1058_v40, %v1041_v55 }
 0x276   :  { %v1169_v50 = vmul.f32 %v1153_v45, %v1135_v32  ;;  %v3236_v32 = vld [vmem:[%s3339_s2] sm:$0xff] }
 0x277   :  { %v1114_v57 = vpop.permute.xlu1 %1113  ;;  %v1089_v46 = vadd.f32 %v1073_v25, %v991_v2  ;;  %v1090_v1 = vadd.f32 %v1074_v28, %v992_v60 }
 0x278   :  { %v1185_v43 = vadd.f32 %v1169_v50, %v1087_v15  ;;  %v1131_v17 = vsel %vm1123_vm1, %v1106_v14, %v1114_v57  ;;  %v1122_v19 = vpop.permute.xlu0 %1121 }
 0x279   :  { %v1170_v13 = vmul.f32 %v1154_v27, %v1131_v17  ;;  %v1127_v48 = vsel %vm1123_vm1, %v1114_v57, %v1122_v19  ;;  %v1139_v38 = vsel %vm1123_vm1, %v1122_v19, %v3097_v41 }
 0x27a   :  { %v1217_v62 = vadd.f32 %v3400_v61, %v1185_v43  ;;  %v1171_v0 = vmul.f32 %v1155_v4, %v1127_v48  ;;  %v1172_v63 = vmul.f32 %v1156_v18, %v1139_v38  ;;  %v3242_v43 = vld [vmem:[%s3339_s2 + $0x8] sm:$0xff]  ;;  %v3250_v48 = vld [vmem:[%s3339_s2 + $0x10] sm:$0xff] }
 0x27b   :  { %v1186_v26 = vadd.f32 %v1170_v13, %v1088_v20 }
 0x27c   :  { %v1812_v54 = vmul.f32 -1.442695, %v1217_v62  ;;  %v1187_v47 = vadd.f32 %v1171_v0, %v1089_v46  ;;  %v1188_v33 = vadd.f32 %v1172_v63, %v1090_v1 }
 0x27d   :  { %v1218_v37 = vadd.f32 %v3400_v61, %v1186_v26 }
 0x27e   :  { %1984 = vpow2.f32 %v1812_v54  ;;  %v1219_v12 = vadd.f32 %v3400_v61, %v1187_v47  ;;  %v1220_v59 = vadd.f32 %v3400_v61, %v1188_v33 }
 0x27f   :  { %v1813_v31 = vmul.f32 -1.442695, %v1218_v37 }
 0x280   :  { %v1814_v51 = vmul.f32 -1.442695, %v1219_v12  ;;  %v1815_v30 = vmul.f32 -1.442695, %v1220_v59 }
 0x281   :  { %1986 = vpow2.f32 %v1813_v31  ;;  %v3264_v31 = vld [vmem:[%s3339_s2 + $0x18] sm:$0xff]  ;;  %s2087_s2 = smov 2  }
 0x282   :  { %1988 = vpow2.f32 %v1814_v51 }
 0x283   :  { %1990 = vpow2.f32 %v1815_v30 }
 0x288   :  { %v1985_v41 = vpop.eup %1984 }
 0x289   :  { %v1281_v34 = vadd.f32 1.0, %v1985_v41 }
 0x28b   :  { %v1987_v3 = vpop.eup %1986  ;;  %1992 = vrcp.f32 %v1281_v34 }
 0x28c   :  { %v1989_v35 = vpop.eup %1988  ;;  %v1282_v39 = vadd.f32 1.0, %v1987_v3 }
 0x28d   :  { %v1991_v52 = vpop.eup %1990  ;;  %v1283_v53 = vadd.f32 1.0, %v1989_v35 }
 0x28e   :  { %1994 = vrcp.f32 %v1282_v39  ;;  %v1284_v40 = vadd.f32 1.0, %v1991_v52 }
 0x28f   :  { %1996 = vrcp.f32 %v1283_v53 }
 0x290   :  { %1998 = vrcp.f32 %v1284_v40 }
 0x295   :  { %v1993_v56 = vpop.eup %1992 }
 0x296   :  { %v3221_v58 = vmul.f32 %v1993_v56, %v1217_v62 }
 0x298   :  { %v1995_v45 = vpop.eup %1994 }
 0x299   :  { %v1997_v9 = vpop.eup %1996  ;;  %v3223_v11 = vmul.f32 %v1995_v45, %v1218_v37 }
 0x29a   :  { %v1999_v55 = vpop.eup %1998  ;;  %v3225_v14 = vmul.f32 %v1997_v9, %v1219_v12 }
 0x29b   :  { %v1342_v42 = vadd.f32 %v3223_v11, %v3221_v58  ;;  %v3229_v10 = vmul.f32 %v1999_v55, %v1220_v59 }
 0x29d   :  { %1343 = vadd.xlane.f32.xlu0 %v1342_v42  ;;  %v1484_v25 = vadd.f32 %v3229_v10, %v3225_v14 }
 0x29f   :  { %1485 = vadd.xlane.f32.xlu1 %v1484_v25 }
 0x2b2   :  { %v1477_v16 = vpop.xlane.xlu0 %1476 }
 0x2b3   :  { %1367 = vrot.lane.b32.xlu0 %v3236_v32, %s2086_s24  ;;  %v1487_v60 = vmul.f32 0.00390625, %v1477_v16 }
 0x2b5   :  { %v1491_v1 = vmul.f32 %v3236_v32, %v1487_v60 }
 0x2b6   :  { %v1335_v15 = vpop.xlane.xlu1 %1334  ;;  %v1338_v28 = vpop.xlane.xlu0 %1337 }
 0x2b7   :  { %v1346_v2 = vmul.f32 0.00390625, %v1338_v28  ;;  %v1345_v57 = vmul.f32 0.00390625, %v1335_v15  ;;  %v1495_v12 = vsel %vm1353_vm9, %v1491_v1, 0.0 }
 0x2b9   :  { %v1350_v17 = vmul.f32 %v3242_v43, %v1346_v2  ;;  %v1349_v19 = vmul.f32 %v3236_v32, %v1345_v57 }
 0x2ba   :  { %v1480_v50 = vpop.xlane.xlu1 %1479 }
 0x2bb   :  { %v1488_v18 = vmul.f32 0.00390625, %v1480_v50  ;;  %v1355_v61 = vsel %vm1353_vm9, %v1350_v17, 0.0  ;;  %v1354_v62 = vsel %vm1353_vm9, %v1349_v19, 0.0 }
 0x2bc   :  { %v1356_v33 = vadd.f32 %v1355_v61, %v1354_v62 }
 0x2bd   :  { %v1492_v13 = vmul.f32 %v3242_v43, %v1488_v18 }
 0x2bf   :  { %v1496_v26 = vsel %vm1353_vm9, %v1492_v13, 0.0 }
 0x2c0   :  { %v1497_v41 = vadd.f32 %v1496_v26, %v1495_v12 }
 0x2e9   :  { %v1341_v27 = vpop.xlane.xlu0 %1340 }
 0x2ea   :  { %v1347_v20 = vmul.f32 0.00390625, %v1341_v27 }
 0x2ec   :  { %v1351_v38 = vmul.f32 %v3250_v48, %v1347_v20 }
 0x2ed   :  { %v1483_v4 = vpop.xlane.xlu1 %1482 }
 0x2ee   :  { %v1489_v46 = vmul.f32 0.00390625, %v1483_v4  ;;  %v1357_v54 = vsel %vm1353_vm9, %v1351_v38, 0.0  ;;  %v3401_v38 = vlaneseq }
 0x2ef   :  { %v1358_v34 = vadd.f32 %v1357_v54, %v1356_v33 }
 0x2f0   :  { %v1493_v0 = vmul.f32 %v3250_v48, %v1489_v46  ;;  %v1379_v1 = vshrl.u32 %v3401_v38, 7 }
 0x2f2   :  { %v1498_v59 = vsel %vm1353_vm9, %v1493_v0, 0.0  ;;  %v1380_v61 = vsub.s32 0, %v1379_v1 }
 0x2f3   :  { %v1499_v39 = vadd.f32 %v1498_v59, %v1497_v41 }
 0x32a   :  { %v1344_v63 = vpop.xlane.xlu0 %1343 }
 0x32b   :  { %v1348_v47 = vmul.f32 0.00390625, %v1344_v63 }
 0x32c   :  { %v1486_v37 = vpop.xlane.xlu1 %1485 }
 0x32d   :  { %v1352_v51 = vmul.f32 %v3264_v31, %v1348_v47  ;;  %v1490_v30 = vmul.f32 0.00390625, %v1486_v37 }
 0x32e   :  { %v1368_v50 = vpop.permute.xlu0 %1367 }
 0x32f   :  { %v1359_v3 = vsel %vm1353_vm9, %v1352_v51, 0.0  ;;  %v1494_v35 = vmul.f32 %v3264_v31, %v1490_v30 }
 0x330   :  { %v1360_v52 = vadd.f32 %v1359_v3, %v1358_v34 }
 0x331   :  { %v1500_v53 = vsel %vm1353_vm9, %v1494_v35, 0.0 }
 0x332   :  { %v1361_v40 = vrot.slane %v1360_v52, 4  ;;  %v1501_v56 = vadd.f32 %v1500_v53, %v1499_v39 }
 0x334   :  { %v1362_v45 = vadd.f32 %v1361_v40, %v1360_v52  ;;  %v1502_v9 = vrot.slane %v1501_v56, 4 }
 0x336   :  { %v1503_v55 = vadd.f32 %v1502_v9, %v1501_v56  ;;  %v1363_v42 = vrot.slane %v1362_v45, 2 }
 0x338   :  { %v1364_v25 = vadd.f32 %v1363_v42, %v1362_v45  ;;  %v1504_v16 = vrot.slane %v1503_v55, 2 }
 0x33a   :  { %v1365_v15 = vrot.slane %v1364_v25, 1  ;;  %v1505_v28 = vadd.f32 %v1504_v16, %v1503_v55 }
 0x33c   :  { %v1366_v27 = vadd.f32 %v1365_v15, %v1364_v25  ;;  %v1506_v2 = vrot.slane %v1505_v28, 1 }
 0x33e   :  { %v1370_v57 = vadd.f32 %v1368_v50, %v1366_v27  ;;  %v1507_v4 = vadd.f32 %v1506_v2, %v1505_v28 }
 0x340   :  { %v1816_v18 = vmul.f32 -1.442695, %v1370_v57  ;;  %v1508_v20 = vadd.f32 %v1507_v4, %v1368_v50 }
 0x342   :  { %2000 = vpow2.f32 %v1816_v18  ;;  %v1821_v60 = vmul.f32 -1.442695, %v1508_v20 }
 0x344   :  { %2002 = vpow2.f32 %v1821_v60 }
 0x34c   :  { %v2001_v17 = vpop.eup %2000 }
 0x34d   :  { %v1374_v19 = vadd.f32 1.0, %v2001_v17 }
 0x34e   :  { %v2003_v46 = vpop.eup %2002 }
 0x34f   :  { %2004 = vrcp.f32 %v1374_v19  ;;  %v1512_v13 = vadd.f32 1.0, %v2003_v46 }
 0x351   :  { %2006 = vrcp.f32 %v1512_v13 }
 0x359   :  { %v2005_v62 = vpop.eup %2004 }
 0x35a   :  { %v1377_v0 = vmul.f32 %v2005_v62, %v1370_v57  ;;  %v2089_v57 = vmov 48  }
 0x35b   :  { %v2007_v63 = vpop.eup %2006  ;;  %1868 = vset.pattern.permute.xlu1 %v2089_v57  ;;  %1869 = vset.pattern.permute.xlu0 %v2089_v57 }
 0x35c   :  { %v1381_v26 = vrot.slane %v1377_v0, %v1380_v61  ;;  %v1515_v54 = vmul.f32 %v2007_v63, %v1508_v20 }
 0x35e   :  { %1383 = vrot.lane.b32.xlu1 %v1381_v26, %s2087_s2  ;;  %v1519_v47 = vrot.slane %v1515_v54, %v1380_v61 }
 0x362   :  { %1521 = vrot.lane.b32.xlu1 %v1519_v47, %s2087_s2 }
 0x3d0   :  { %v1384_v33 = vpop.permute.xlu1 %1383 }
 0x3d1   :  { %v1386_v37 = vmul.f32 %v3236_v32, %v1384_v33  ;;  %v1387_v12 = vmul.f32 %v3242_v43, %v1384_v33  ;;  %v1388_v41 = vmul.f32 %v3250_v48, %v1384_v33  ;;  %v1389_v34 = vmul.f32 %v3264_v31, %v1384_v33 }
 0x3d3   :  { %1396 = vrot.lane.b32.xlu1 %v1387_v12, %s2088_s4  ;;  %1394 = vrot.lane.b32.xlu0 %v1386_v37, %s2088_s4 }
 0x3d4   :  { %v1522_v59 = vpop.permute.xlu1 %1521 }
 0x3d5   :  { %v1524_v51 = vmul.f32 %v3236_v32, %v1522_v59  ;;  %v1525_v30 = vmul.f32 %v3242_v43, %v1522_v59  ;;  %v1526_v3 = vmul.f32 %v3250_v48, %v1522_v59  ;;  %v1527_v35 = vmul.f32 %v3264_v31, %v1522_v59 }
 0x3d7   :  { %1534 = vrot.lane.b32.xlu1 %v1525_v30, %s2088_s4  ;;  %1532 = vrot.lane.b32.xlu0 %v1524_v51, %s2088_s4 }
 0x3db   :  { %1400 = vrot.lane.b32.xlu1 %v1389_v34, %s2088_s4  ;;  %1398 = vrot.lane.b32.xlu0 %v1388_v41, %s2088_s4 }
 0x3df   :  { %1538 = vrot.lane.b32.xlu1 %v1527_v35, %s2088_s4  ;;  %1536 = vrot.lane.b32.xlu0 %v1526_v3, %s2088_s4 }
 0x445   :  { %v1395_v39 = vpop.permute.xlu0 %1394  ;;  %v1397_v52 = vpop.permute.xlu1 %1396 }
 0x446   :  { %v1407_v53 = vsel %vm1406_vm10, %v1395_v39, 0.0  ;;  %v1410_v40 = vsel %vm1406_vm10, %v1397_v52, 0.0 }
 0x447   :  { %1408 = vadd.xlane.f32.xlu0 %v1407_v53  ;;  %1411 = vadd.xlane.f32.xlu1 %v1410_v40 }
 0x449   :  { %v1533_v56 = vpop.permute.xlu0 %1532  ;;  %v1535_v45 = vpop.permute.xlu1 %1534 }
 0x44a   :  { %v1544_v9 = vsel %vm1406_vm10, %v1533_v56, 0.0  ;;  %v1547_v25 = vsel %vm1406_vm10, %v1535_v45, 0.0 }
 0x44b   :  { %1545 = vadd.xlane.f32.xlu0 %v1544_v9 }
 0x44d   :  { %v1399_v55 = vpop.permute.xlu0 %1398  ;;  %v1401_v42 = vpop.permute.xlu1 %1400 }
 0x44e   :  { %v1413_v16 = vsel %vm1406_vm10, %v1399_v55, 0.0  ;;  %v1416_v28 = vsel %vm1406_vm10, %v1401_v42, 0.0 }
 0x44f   :  { %1414 = vadd.xlane.f32.xlu1 %v1413_v16  ;;  %1548 = vadd.xlane.f32.xlu0 %v1547_v25 }
 0x451   :  { %v1537_v15 = vpop.permute.xlu0 %1536  ;;  %v1539_v27 = vpop.permute.xlu1 %1538 }
 0x452   :  { %v1550_v50 = vsel %vm1406_vm10, %v1537_v15, 0.0  ;;  %v1553_v2 = vsel %vm1406_vm10, %v1539_v27, 0.0 }
 0x453   :  { %1551 = vadd.xlane.f32.xlu1 %v1550_v50  ;;  %1417 = vadd.xlane.f32.xlu0 %v1416_v28 }
 0x457   :  { %1554 = vadd.xlane.f32.xlu0 %v1553_v2 }
 0x4d4   :  { %v1409_v4 = vpop.xlane.xlu0 %1408  ;;  %v1412_v18 = vpop.xlane.xlu1 %1411 }
 0x4d5   :  { %v1419_v20 = vadd.f32 %v3236_v32, %v1409_v4  ;;  %v1420_v60 = vadd.f32 %v3242_v43, %v1412_v18  ;;  %v2091_v18 = vmov 49  }
 0x4d7   :  { %v1817_v17 = vmul.f32 -1.442695, %v1419_v20  ;;  %v1818_v19 = vmul.f32 -1.442695, %v1420_v60 }
 0x4d8   :  { %v1546_v46 = vpop.xlane.xlu0 %1545 }
 0x4d9   :  { %2008 = vpow2.f32 %v1817_v17  ;;  %v1556_v13 = vadd.f32 %v3236_v32, %v1546_v46 }
 0x4da   :  { %2010 = vpow2.f32 %v1818_v19 }
 0x4db   :  { %v1822_v38 = vmul.f32 -1.442695, %v1556_v13 }
 0x4dc   :  { %v1549_v1 = vpop.xlane.xlu0 %1548  ;;  %v1415_v61 = vpop.xlane.xlu1 %1414 }
 0x4dd   :  { %2012 = vpow2.f32 %v1822_v38  ;;  %v1557_v62 = vadd.f32 %v3242_v43, %v1549_v1  ;;  %v1421_v0 = vadd.f32 %v3250_v48, %v1415_v61 }
 0x4df   :  { %v1823_v63 = vmul.f32 -1.442695, %v1557_v62  ;;  %v1819_v26 = vmul.f32 -1.442695, %v1421_v0 }
 0x4e0   :  { %v1418_v54 = vpop.xlane.xlu0 %1417  ;;  %v1552_v47 = vpop.xlane.xlu1 %1551 }
 0x4e1   :  { %2014 = vpow2.f32 %v1823_v63  ;;  %v1422_v33 = vadd.f32 %v3264_v31, %v1418_v54  ;;  %v1558_v37 = vadd.f32 %v3250_v48, %v1552_v47 }
 0x4e2   :  { %2016 = vpow2.f32 %v1819_v26 }
 0x4e3   :  { %v2009_v12 = vpop.eup %2008  ;;  %v1820_v59 = vmul.f32 -1.442695, %v1422_v33  ;;  %v1824_v43 = vmul.f32 -1.442695, %v1558_v37 }
 0x4e4   :  { %v2011_v51 = vpop.eup %2010  ;;  %v1435_v30 = vadd.f32 1.0, %v2009_v12  ;;  %v1555_v41 = vpop.xlane.xlu0 %1554 }
 0x4e5   :  { %v1436_v34 = vadd.f32 1.0, %v2011_v51  ;;  %2018 = vpow2.f32 %v1820_v59  ;;  %v1559_v3 = vadd.f32 %v3264_v31, %v1555_v41 }
 0x4e6   :  { %2020 = vrcp.f32 %v1435_v30 }
 0x4e7   :  { %v2013_v35 = vpop.eup %2012  ;;  %2022 = vrcp.f32 %v1436_v34  ;;  %v1825_v52 = vmul.f32 -1.442695, %v1559_v3 }
 0x4e8   :  { %v1572_v39 = vadd.f32 1.0, %v2013_v35  ;;  %2024 = vpow2.f32 %v1824_v43 }
 0x4ea   :  { %2026 = vrcp.f32 %v1572_v39 }
 0x4eb   :  { %v2015_v53 = vpop.eup %2014  ;;  %2028 = vpow2.f32 %v1825_v52 }
 0x4ec   :  { %v2017_v48 = vpop.eup %2016  ;;  %v1573_v40 = vadd.f32 1.0, %v2015_v53 }
 0x4ed   :  { %v1437_v56 = vadd.f32 1.0, %v2017_v48  ;;  %v2046_v48 = vld [vmem:[%s3337_s0 + $0x10] sm:$0xff] }
 0x4ee   :  { %2030 = vrcp.f32 %v1573_v40 }
 0x4ef   :  { %v2019_v45 = vpop.eup %2018  ;;  %2032 = vrcp.f32 %v1437_v56  ;;  %v2047_v56 = vld [vmem:[%s3337_s0 + $0x18] sm:$0xff] }
 0x4f0   :  { %v2021_v9 = vpop.eup %2020  ;;  %v1438_v42 = vadd.f32 1.0, %v2019_v45 }
 0x4f1   :  { %v2023_v55 = vpop.eup %2022  ;;  %1449 = vperm.xlu1 %1868, %v2021_v9  }
 0x4f2   :  { %1454 = vperm.xlu0 %1869, %v2023_v55   ;;  %v2025_v31 = vpop.eup %2024  ;;  %2034 = vrcp.f32 %v1438_v42 }
 0x4f3   :  { %v1574_v16 = vadd.f32 1.0, %v2025_v31 }
 0x4f4   :  { %v2027_v25 = vpop.eup %2026 }
 0x4f5   :  { %1586 = vperm.xlu1 %1868, %v2027_v25   ;;  %v2029_v15 = vpop.eup %2028  ;;  %2036 = vrcp.f32 %v1574_v16 }
 0x4f6   :  { %v1575_v50 = vadd.f32 1.0, %v2029_v15  ;;  %1871 = vset.pattern.permute.xlu0 %v2091_v18 }
 0x4f8   :  { %v2031_v28 = vpop.eup %2030  ;;  %2038 = vrcp.f32 %v1575_v50 }
 0x4f9   :  { %1591 = vperm.xlu1 %1868, %v2031_v28   ;;  %v2033_v27 = vpop.eup %2032 }
 0x4fc   :  { %v2035_v2 = vpop.eup %2034 }
 0x4fd   :  { %1459 = vperm.xlu1 %1868, %v2033_v27  }
 0x4ff   :  { %v2037_v57 = vpop.eup %2036 }
 0x501   :  { %1464 = vperm.xlu1 %1868, %v2035_v2  }
 0x502   :  { %v2039_v4 = vpop.eup %2038 }
 0x505   :  { %1596 = vperm.xlu1 %1868, %v2037_v57  }
 0x509   :  { %1601 = vperm.xlu1 %1868, %v2039_v4  }
 0x50d   :  { %1616 = vrot.lane.b32.xlu1 %v3236_v32, %s2090_s1 }
 0x50e   :  { %1870 = vset.pattern.permute.xlu1 %v2091_v18 }
 0x511   :  { %1613 = vperm.xlu1 %1870, %v3236_v32  }
 0x570   :  { %v1450_v20 = vpop.permute.xlu1 %1449 }
 0x571   :  { %v1455_v60 = vpop.permute.xlu0 %1454  ;;  %v1467_v17 = vmul.f32 %v1450_v20, %v2971_v29  ;;  %v1468_v19 = vmul.f32 %v1450_v20, %v2974_v22 }
 0x572   :  { %v1469_v46 = vmul.f32 %v1455_v60, %v2983_v49  ;;  %v1470_v13 = vmul.f32 %v1455_v60, %v2986_v24 }
 0x574   :  { %v1828_v38 = vpack.c.bf16 %v1470_v13, %v1468_v19  ;;  %v1830_v1 = vpack.c.bf16 %v1469_v46, %v1467_v17  ;;  %v1587_v61 = vpop.permute.xlu1 %1586 }
 0x575   :  { %v1604_v0 = vmul.f32 %v1587_v61, %v2940_v36  ;;  %v1605_v32 = vmul.f32 %v1587_v61, %v2943_v7 }
 0x576   :  { %1829 = vmatprep.subr.bf16.mxu0 %v1828_v38 }
 0x577   :  { %1831 = vmatpush1.bf16.msra.mxu0 %v1830_v1 }
 0x578   :  { %v1592_v62 = vpop.permute.xlu1 %1591 }
 0x579   :  { %v1606_v63 = vmul.f32 %v1592_v62, %v3011_v5  ;;  %v1607_v29 = vmul.f32 %v1592_v62, %v3014_v6 }
 0x57b   :  { %v1836_v26 = vpack.c.bf16 %v1607_v29, %v1605_v32  ;;  %v1838_v22 = vpack.c.bf16 %v1606_v63, %v1604_v0 }
 0x57c   :  { %v1460_v54 = vpop.permute.xlu1 %1459 }
 0x57d   :  { %1837 = vmatprep.subr.bf16.mxu1 %v1836_v26  ;;  %v1471_v24 = vmul.f32 %v1460_v54, %v3103_v21  ;;  %v1472_v47 = vmul.f32 %v1460_v54, %v3107_v44 }
 0x57e   :  { %1839 = vmatpush1.bf16.msra.mxu1 %v1838_v22 }
 0x580   :  { %v1465_v49 = vpop.permute.xlu1 %1464 }
 0x581   :  { %v1473_v33 = vmul.f32 %v1465_v49, %v3221_v58  ;;  %v1474_v36 = vmul.f32 %v1465_v49, %v3223_v11 }
 0x583   :  { %v1832_v37 = vpack.c.bf16 %v1474_v36, %v1472_v47  ;;  %v1834_v7 = vpack.c.bf16 %v1473_v33, %v1471_v24 }
 0x584   :  { %v1597_v12 = vpop.permute.xlu1 %1596 }
 0x585   :  { %1833 = vmatprep.subr.bf16.mxu0 %v1832_v37  ;;  %v1608_v6 = vmul.f32 %v1597_v12, %v3115_v8  ;;  %v1609_v59 = vmul.f32 %v1597_v12, %v3117_v23  ;;  %v2044_v8 = vld [vmem:[%s3337_s0] sm:$0xff] }
 0x586   :  { %1835 = vmatpush1.bf16.msra.mxu0 %v1834_v7 }
 0x588   :  { %v1602_v5 = vpop.permute.xlu1 %1601 }
 0x589   :  { %v1610_v51 = vmul.f32 %v1602_v5, %v3225_v14  ;;  %v1611_v21 = vmul.f32 %v1602_v5, %v3229_v10  ;;  %v2045_v10 = vld [vmem:[%s3337_s0 + $0x8] sm:$0xff] }
 0x58b   :  { %v1840_v44 = vpack.c.bf16 %v1611_v21, %v1609_v59  ;;  %v1842_v30 = vpack.c.bf16 %v1610_v51, %v1608_v6 }
 0x58c   :  { %v1617_v58 = vpop.permute.xlu1 %1616 }
 0x58d   :  { %1841 = vmatprep.subr.bf16.mxu1 %v1840_v44  ;;  %1826 = vmatmul.mubr.msk.f32.vlgmr.msra.gmra.mrb[8].mxu0 %vm1618_vm11, %v1617_v58 }
 0x58e   :  { %1843 = vmatpush1.bf16.msra.mxu1 %v1842_v30 }
 0x590   :  { %v1614_v11 = vpop.permute.xlu1 %1613 }
 0x591   :  { %1827 = vmatmul.mubr.msk.f32.vlgmr.msra.gmra.mrb[8].mxu1 %vm1618_vm11, %v1617_v58 }
 0x660   :  { %v1687_v41 = vpop.f32.mrb[8].mxu0 }
 0x661   :  { %v1689_v34 = vpop.f32.mrb[9].mxu0  ;;  %v1688_v43 = vadd.f32 %v1687_v41, %v1614_v11 }
 0x662   :  { %v1690_v3 = vadd.f32 %v1689_v34, %v1614_v11 }
 0x663   :  { %v1763_v23 = vadd.f32 %v2044_v8, %v1688_v43 }
 0x664   :  { %v1758_v14 = vpop.f32.mrb[8].mxu1  ;;  %v1764_v35 = vadd.f32 %v2045_v10, %v1690_v3 }
 0x665   :  { %v1760_v39 = vpop.f32.mrb[9].mxu1  ;;  %v1759_v52 = vadd.f32 %v1758_v14, %v1614_v11  ;;  %1767 = vst [vmem:[%s3340_s3] sm:$0xff] %v1763_v23 }
 0x666   :  { %v1761_v53 = vadd.f32 %v1760_v39, %v1614_v11  ;;  %1768 = vst [vmem:[%s3340_s3 + $0x8] sm:$0xff] %v1764_v35 }
 0x667   :  { %v1765_v40 = vadd.f32 %v2046_v48, %v1759_v52 }
 0x668   :  { %v1766_v45 = vadd.f32 %v2047_v56, %v1761_v53 }
 0x669   :  { %1769 = vst [vmem:[%s3340_s3 + $0x10] sm:$0xff] %v1765_v40 }
 0x66a   :  { %1770 = vst [vmem:[%s3340_s3 + $0x18] sm:$0xff] %v1766_v45 }
 0x66b   :  { %1775 = vsyncpa [#allocation3], 1 }

</bundles_post_ra>
